<compile_context>
chip_gen: v7x
topology: tpu7x:2x2x1
jax: 0.10.0
libtpu: 0.0.40
codegen_flags: <defaults>
</compile_context>

<pallas_src>
import functools

import jax
import jax.numpy as jnp
from jax.experimental import pallas as pl
from jax.experimental.pallas import tpu as pltpu

HIDDEN = 256


def discriminator_kernel(xT_ref, w1_ref, b1_ref, w2_ref, b2_ref, out_ref):
    # ----- Layer 1: h^T = relu(W1 @ x^T + b1) ------------------------------
    # K (= #input features) is tiny, so unroll it as VPU broadcast FMAs:
    #   (H, 1) * (1, TB) -> (H, TB), accumulated over k.  No MXU involved.
    num_features = xT_ref.shape[0]                       # static (4)
    h = w1_ref[:, 0:1] * xT_ref[0:1, :]
    for k in range(1, num_features):                     # static Python unroll
        h = h + w1_ref[:, k:k + 1] * xT_ref[k:k + 1, :]
    h = jnp.maximum(h + b1_ref[...], 0.0)                # bias + ReLU

    # ----- Layer 2: y^T = sigmoid(w2 . h^T + b2) ---------------------------
    # VPU multiply + sublane (XLU) reduction; result is a lane-dense row so the
    # store is an unmasked, full-lane vst.
    o = jnp.sum(h * w2_ref[...], axis=0, keepdims=True)  # (1, TB)
    o = o + b2_ref[0]                                    # scalar bias from SMEM
    # sigmoid(x) = 1 / (1 + exp(-x)): exp + approx reciprocal both hit the EUP.
    out_ref[...] = pl.reciprocal(1.0 + jnp.exp(-o), approx=True).astype(
        out_ref.dtype)


@functools.partial(jax.jit, static_argnames=("tb",))
def discriminator_forward(x, w1, b1, w2, b2, *, tb=128):
    """Forward pass.

    x : (B, F) float32 (PyTorch (batch, features) convention)
    w1: (H, F)  b1: (H,)   -- PyTorch-native nn.Linear layouts
    w2: (1, H)  b2: (1,)
    returns (B, 1) float32, matching Discriminator.forward.
    """
    B, F = x.shape
    H = w1.shape[0]
    n_tiles = pl.cdiv(B, tb)
    b_pad = n_tiles * tb

    # Layout plumbing (tiny XLA ops): batch goes to lanes, pad to a tile multiple.
    xT = jnp.zeros((F, b_pad), x.dtype).at[:, :B].set(x.T)
    b1_col = b1.reshape(H, 1)
    w2_col = w2.reshape(H, 1)
    b2_s = b2.reshape(1).astype(jnp.float32)

    out = pl.pallas_call(
        discriminator_kernel,
        out_shape=jax.ShapeDtypeStruct((1, b_pad), jnp.float32),
        grid=(n_tiles,),
        in_specs=[
            pl.BlockSpec((F, tb), lambda i: (0, i)),            # x^T tile (streams)
            pl.BlockSpec((H, F), lambda i: (0, 0)),             # W1, VMEM-resident
            pl.BlockSpec((H, 1), lambda i: (0, 0)),             # b1, VMEM-resident
            pl.BlockSpec((H, 1), lambda i: (0, 0)),             # w2, VMEM-resident
            pl.BlockSpec(memory_space=pltpu.MemorySpace.SMEM),  # b2 scalar in SMEM
        ],
        out_specs=pl.BlockSpec((1, tb), lambda i: (0, i)),      # lane-dense output
        compiler_params=pltpu.CompilerParams(
            dimension_semantics=("parallel",)),                 # v7x megacore
    )(xT, w1, b1_col, w2_col, b2_s)

    return out[0, :B].reshape(B, 1)


def init_params(key, in_features=4, hidden=HIDDEN):
    # Deterministic init mimicking PyTorch nn.Linear default:
    #   U(-1/sqrt(fan_in), 1/sqrt(fan_in)) for both weight and bias.
    k1, k2, k3, k4 = jax.random.split(key, 4)
    bound1 = 1.0 / (in_features ** 0.5)
    bound2 = 1.0 / (hidden ** 0.5)
    # PyTorch-native (out_features, in_features) layout.
    w1 = jax.random.uniform(k1, (hidden, in_features), jnp.float32, -bound1, bound1)
    b1 = jax.random.uniform(k2, (hidden,), jnp.float32, -bound1, bound1)
    w2 = jax.random.uniform(k3, (1, hidden), jnp.float32, -bound2, bound2)
    b2 = jax.random.uniform(k4, (1,), jnp.float32, -bound2, bound2)
    return w1, b1, w2, b2


def reference_forward(x, w1, b1, w2, b2):
    h = jnp.maximum(x @ w1.T + b1, 0.0)
    return jax.nn.sigmoid(h @ w2.T + b2)


if __name__ == "__main__":
    key = jax.random.PRNGKey(0)
    k_x, k_p = jax.random.split(key)

    # Iris-like problem: 150 samples x 4 features (synthetic standardized data).
    B, F = 150, 4
    x = jax.random.normal(k_x, (B, F), jnp.float32)
    w1, b1, w2, b2 = init_params(k_p, in_features=F, hidden=HIDDEN)

    out = discriminator_forward(x, w1, b1, w2, b2)
    out = jax.block_until_ready(out)

    ref = reference_forward(x, w1, b1, w2, b2)
    assert out.shape == (B, 1)
    # Approx (EUP) reciprocal in the sigmoid -> slightly relaxed tolerance.
    max_err = float(jnp.max(jnp.abs(out - ref)))
    assert max_err < 2e-3, f"max abs err {max_err}"

    print("KERNEL_OK")
</pallas_src>

<mosaic_0001>
module attributes {stable_mosaic.version = 11 : i64} {
  func.func @discriminator_kernel(%arg0: i32, %arg1: memref<4x128xf32, #tpu.memory_space<vmem>>, %arg2: memref<256x4xf32, #tpu.memory_space<vmem>>, %arg3: memref<256x1xf32, #tpu.memory_space<vmem>>, %arg4: memref<256x1xf32, #tpu.memory_space<vmem>>, %arg5: memref<1xf32, #tpu.memory_space<smem>>, %arg6: memref<1x128xf32, #tpu.memory_space<vmem>>) attributes {dimension_semantics = [#tpu.dimension_semantics<parallel>], iteration_bounds = array<i64: 2>, scalar_prefetch = 0 : i64, scratch_operands = 0 : i64, tpu.core_type = #tpu.core_type<tc>, window_params = [{transform_indices = @transform_0, window_bounds = array<i64: 4, 128>}, {pipeline_mode = #tpu.pipeline_mode<synchronous>, transform_indices = @transform_1, window_bounds = array<i64: 256, 4>}, {pipeline_mode = #tpu.pipeline_mode<synchronous>, transform_indices = @transform_2, window_bounds = array<i64: 256, 1>}, {pipeline_mode = #tpu.pipeline_mode<synchronous>, transform_indices = @transform_3, window_bounds = array<i64: 256, 1>}, {transform_indices = @transform_4, window_bounds = array<i64: 1>}, {transform_indices = @transform_5, window_bounds = array<i64: 1, 128>}]} {
    %c0 = arith.constant 0 : index
    %c0_0 = arith.constant 0 : index
    %0 = vector.load %arg2[%c0, %c0_0] : memref<256x4xf32, #tpu.memory_space<vmem>>, vector<256x1xf32>
    %c0_1 = arith.constant 0 : index
    %c0_2 = arith.constant 0 : index
    %1 = vector.load %arg1[%c0_1, %c0_2] : memref<4x128xf32, #tpu.memory_space<vmem>>, vector<1x128xf32>
    %2 = vector.broadcast %0 : vector<256x1xf32> to vector<256x128xf32>
    %3 = vector.broadcast %1 : vector<1x128xf32> to vector<256x128xf32>
    %4 = arith.mulf %2, %3 : vector<256x128xf32>
    %c0_3 = arith.constant 0 : index
    %c1 = arith.constant 1 : index
    %5 = vector.load %arg2[%c0_3, %c1] : memref<256x4xf32, #tpu.memory_space<vmem>>, vector<256x1xf32>
    %c1_4 = arith.constant 1 : index
    %c0_5 = arith.constant 0 : index
    %6 = vector.load %arg1[%c1_4, %c0_5] : memref<4x128xf32, #tpu.memory_space<vmem>>, vector<1x128xf32>
    %7 = vector.broadcast %5 : vector<256x1xf32> to vector<256x128xf32>
    %8 = vector.broadcast %6 : vector<1x128xf32> to vector<256x128xf32>
    %9 = arith.mulf %7, %8 : vector<256x128xf32>
    %10 = arith.addf %4, %9 : vector<256x128xf32>
    %c0_6 = arith.constant 0 : index
    %c2 = arith.constant 2 : index
    %11 = vector.load %arg2[%c0_6, %c2] : memref<256x4xf32, #tpu.memory_space<vmem>>, vector<256x1xf32>
    %c2_7 = arith.constant 2 : index
    %c0_8 = arith.constant 0 : index
    %12 = vector.load %arg1[%c2_7, %c0_8] : memref<4x128xf32, #tpu.memory_space<vmem>>, vector<1x128xf32>
    %13 = vector.broadcast %11 : vector<256x1xf32> to vector<256x128xf32>
    %14 = vector.broadcast %12 : vector<1x128xf32> to vector<256x128xf32>
    %15 = arith.mulf %13, %14 : vector<256x128xf32>
    %16 = arith.addf %10, %15 : vector<256x128xf32>
    %c0_9 = arith.constant 0 : index
    %c3 = arith.constant 3 : index
    %17 = vector.load %arg2[%c0_9, %c3] : memref<256x4xf32, #tpu.memory_space<vmem>>, vector<256x1xf32>
    %c3_10 = arith.constant 3 : index
    %c0_11 = arith.constant 0 : index
    %18 = vector.load %arg1[%c3_10, %c0_11] : memref<4x128xf32, #tpu.memory_space<vmem>>, vector<1x128xf32>
    %19 = vector.broadcast %17 : vector<256x1xf32> to vector<256x128xf32>
    %20 = vector.broadcast %18 : vector<1x128xf32> to vector<256x128xf32>
    %21 = arith.mulf %19, %20 : vector<256x128xf32>
    %22 = arith.addf %16, %21 : vector<256x128xf32>
    %c0_12 = arith.constant 0 : index
    %c0_13 = arith.constant 0 : index
    %23 = vector.load %arg3[%c0_12, %c0_13] : memref<256x1xf32, #tpu.memory_space<vmem>>, vector<256x1xf32>
    %24 = vector.broadcast %23 : vector<256x1xf32> to vector<256x128xf32>
    %25 = arith.addf %22, %24 : vector<256x128xf32>
    %cst = arith.constant 0.000000e+00 : f32
    %26 = vector.broadcast %cst : f32 to vector<256x128xf32>
    %27 = arith.maximumf %25, %26 : vector<256x128xf32>
    %c0_14 = arith.constant 0 : index
    %c0_15 = arith.constant 0 : index
    %28 = vector.load %arg4[%c0_14, %c0_15] : memref<256x1xf32, #tpu.memory_space<vmem>>, vector<256x1xf32>
    %29 = vector.broadcast %28 : vector<256x1xf32> to vector<256x128xf32>
    %30 = arith.mulf %27, %29 : vector<256x128xf32>
    %cst_16 = arith.constant dense<0.000000e+00> : vector<128xf32>
    %31 = vector.multi_reduction <add>, %30, %cst_16 [0] : vector<256x128xf32> to vector<128xf32>
    %32 = vector.shape_cast %31 : vector<128xf32> to vector<1x128xf32>
    %c0_17 = arith.constant 0 : index
    %33 = memref.load %arg5[%c0_17] : memref<1xf32, #tpu.memory_space<smem>>
    %34 = vector.broadcast %33 : f32 to vector<1x128xf32>
    %35 = arith.addf %32, %34 : vector<1x128xf32>
    %cst_18 = arith.constant 0.000000e+00 : f32
    %36 = vector.broadcast %cst_18 : f32 to vector<1x128xf32>
    %37 = arith.subf %36, %35 : vector<1x128xf32>
    %38 = math.exp %37 : vector<1x128xf32>
    %cst_19 = arith.constant 1.000000e+00 : f32
    %39 = vector.broadcast %cst_19 : f32 to vector<1x128xf32>
    %40 = arith.addf %39, %38 : vector<1x128xf32>
    %41 = tpu.reciprocal %40 {approx = true} : vector<1x128xf32> -> vector<1x128xf32>
    %c0_20 = arith.constant 0 : index
    %c0_21 = arith.constant 0 : index
    %42 = vector.load %arg6[%c0_20, %c0_21] : memref<1x128xf32, #tpu.memory_space<vmem>>, vector<1x128xf32>
    tpu.vector_store %arg6[%c0_20, %c0_21], %41 {strides = array<i32>} : memref<1x128xf32, #tpu.memory_space<vmem>>, vector<1x128xf32>,
    return
  }
  func.func @transform_0(%arg0: i32) -> (i32, i32) {
    %c0_i32 = arith.constant 0 : i32
    %c0_i32_0 = arith.constant 0 : i32
    return %c0_i32, %arg0 : i32, i32
  }
  func.func @transform_1(%arg0: i32) -> (i32, i32) {
    %c0_i32 = arith.constant 0 : i32
    %c0_i32_0 = arith.constant 0 : i32
    %c0_i32_1 = arith.constant 0 : i32
    return %c0_i32, %c0_i32_0 : i32, i32
  }
  func.func @transform_2(%arg0: i32) -> (i32, i32) {
    %c0_i32 = arith.constant 0 : i32
    %c0_i32_0 = arith.constant 0 : i32
    %c0_i32_1 = arith.constant 0 : i32
    return %c0_i32, %c0_i32_0 : i32, i32
  }
  func.func @transform_3(%arg0: i32) -> (i32, i32) {
    %c0_i32 = arith.constant 0 : i32
    %c0_i32_0 = arith.constant 0 : i32
    %c0_i32_1 = arith.constant 0 : i32
    return %c0_i32, %c0_i32_0 : i32, i32
  }
  func.func @transform_4(%arg0: i32) -> i32 {
    %c0_i32 = arith.constant 0 : i32
    %c0_i32_0 = arith.constant 0 : i32
    return %c0_i32 : i32
  }
  func.func @transform_5(%arg0: i32) -> (i32, i32) {
    %c0_i32 = arith.constant 0 : i32
    %c0_i32_0 = arith.constant 0 : i32
    return %c0_i32, %arg0 : i32, i32
  }
}

</mosaic_0001>

<bundles_post_ra>
// kernel: discriminator_forward.1
= control target key start
LH: loop header
LB: loop body
LE: loop exit
PB: predicated region body
PF: predicated region fallthrough
CT: control target
= control target key end

     0   :  { %s1694_s20 = smov 0   ;;  %s2742_s0 = inlined_call_operand.vmem [shape: f32[4,256], index: 0, kind: input, shape index: {}]   ;;  %s2743_s1 = inlined_call_operand.vmem [shape: f32[256,4], index: 1, kind: input, shape index: {}]   ;;  %s2744_s2 = inlined_call_operand.vmem [shape: f32[256,1], index: 2, kind: input, shape index: {}]   ;;  %s2745_s3 = inlined_call_operand.vmem [shape: f32[256,1], index: 3, kind: input, shape index: {}]   ;;  %s2746_s4 = inlined_call_operand.<no memory space> [shape: f32[1], index: 4, kind: input, shape index: {}]   ;;  %s2747_s5 = inlined_call_operand.vmem [shape: f32[1,256], index: 5, kind: output, shape index: {}]  }
   0x1   :  { %10 = sst [smem:[#allocation2]] %s2746_s4 }
   0x2 LB: > { %s1612_s21 = sadd.s32 4294967295, %s1655_s20   ;;  %p1616_p0 = scmp.ge.s32.totalorder %s1655_s20, 1  ;;  %s1655_s20 = sphi %s1694_s20, %s16_s20  }
   0x3   : > { %p187_p1 = scmp.lt.s32.totalorder %s1655_s20, 3 }
   0x5   : > { %p188_p2 = pnand %p1616_p0, %p187_p1 }
   0x7   : > { %191 = sbr.rel (%p188_p2) target bundleno = 583 (0x247), region = 40 }
   0xe   : > { %v1705_v0 = vld [vmem:[%s2743_s1 + $0x10] sm:$0xff]  ;;  %v1710_v1 = vld [vmem:[%s2743_s1] sm:$0xff]  ;;  %v1657_v2 = vmov 1   ;;  %v2748_v3 = vmov 0   ;;  %v1718_v4 = vld [vmem:[%s2743_s1 + $0x18] sm:$0xff]  ;;  %v1659_v20 = vmov 2  }
   0xf   : > { %1637 = vset.pattern.permute.xlu0 %v1657_v2  ;;  %1636 = vset.pattern.permute.xlu1 %v2748_v3  ;;  %v1725_v5 = vld [vmem:[%s2743_s1 + $0x28] sm:$0xff]  ;;  %v1732_v6 = vld [vmem:[%s2743_s1 + $0x38] sm:$0xff]  ;;  %v1830_v21 = vld [vmem:[%s2743_s1 + $0x20] sm:$0xff]  ;;  %v1660_v35 = vmov 3   ;;  %p212_p3 = scmp.lt.s32.totalorder %s1612_s21, 1 }
  0x10   : > { %264 = vperm.xlu1 %1636, %v1705_v0   ;;  %450 = vperm.xlu0 %1637, %v1710_v1   ;;  %v1739_v7 = vld [vmem:[%s2743_s1 + $0x48] sm:$0xff]  ;;  %v1746_v8 = vld [vmem:[%s2743_s1 + $0x58] sm:$0xff]  ;;  %v1837_v22 = vld [vmem:[%s2743_s1 + $0x30] sm:$0xff] }
  0x11   : > { %v1753_v9 = vld [vmem:[%s2743_s1 + $0x68] sm:$0xff]  ;;  %v1760_v10 = vld [vmem:[%s2743_s1 + $0x78] sm:$0xff]  ;;  %v1844_v23 = vld [vmem:[%s2743_s1 + $0x40] sm:$0xff]  ;;  %s2857_s21 = smov (!%p212_p3, %s1612_s21), 1 }
  0x12   : > { %v1767_v11 = vld [vmem:[%s2743_s1 + $0x88] sm:$0xff]  ;;  %v1774_v12 = vld [vmem:[%s2743_s1 + $0x98] sm:$0xff]  ;;  %v1851_v24 = vld [vmem:[%s2743_s1 + $0x50] sm:$0xff]  ;;  %s1617_s25 = sshll.u32 %s2857_s21, 2  ;;  %s218_s28 = scalar_lea.vmem %s2747_s5, %s2857_s21 }
  0x13   : > { %v1781_v13 = vld [vmem:[%s2743_s1 + $0xa8] sm:$0xff]  ;;  %v1788_v14 = vld [vmem:[%s2743_s1 + $0xb8] sm:$0xff]  ;;  %v1858_v25 = vld [vmem:[%s2743_s1 + $0x60] sm:$0xff]  ;;  %s215_s7 = scalar_lea.vmem %s2742_s0, %s1617_s25  ;;  %s1556_s25 = sld [smem:[#allocation2]] }
  0x14   : > { %269 = vperm.xlu1 %1636, %v1718_v4   ;;  %462 = vperm.xlu0 %1637, %v1718_v4   ;;  %v1795_v15 = vld [vmem:[%s2743_s1 + $0xc8] sm:$0xff]  ;;  %v1802_v16 = vld [vmem:[%s2743_s1 + $0xd8] sm:$0xff]  ;;  %v1865_v26 = vld [vmem:[%s2743_s1 + $0x70] sm:$0xff] }
  0x15   : > { %v1809_v17 = vld [vmem:[%s2743_s1 + $0xe8] sm:$0xff]  ;;  %v1816_v18 = vld [vmem:[%s2743_s1 + $0xf8] sm:$0xff]  ;;  %v1872_v27 = vld [vmem:[%s2743_s1 + $0x80] sm:$0xff] }
  0x16   : > { %v1823_v19 = vld [vmem:[%s2743_s1 + $0x8] sm:$0xff]  ;;  %v1879_v28 = vld [vmem:[%s2743_s1 + $0x90] sm:$0xff]  ;;  %v1886_v29 = vld [vmem:[%s2743_s1 + $0xa0] sm:$0xff] }
  0x17   : > { %v1893_v30 = vld [vmem:[%s2743_s1 + $0xb0] sm:$0xff]  ;;  %v1900_v31 = vld [vmem:[%s2743_s1 + $0xc0] sm:$0xff] }
  0x18   : > { %279 = vperm.xlu1 %1636, %v1725_v5   ;;  %470 = vperm.xlu0 %1637, %v1725_v5   ;;  %v1907_v32 = vld [vmem:[%s2743_s1 + $0xd0] sm:$0xff]  ;;  %v1914_v33 = vld [vmem:[%s2743_s1 + $0xe0] sm:$0xff] }
  0x19   : > { %v1921_v34 = vld [vmem:[%s2743_s1 + $0xf0] sm:$0xff] }
  0x1c   : > { %289 = vperm.xlu1 %1636, %v1732_v6   ;;  %478 = vperm.xlu0 %1637, %v1732_v6  }
  0x20   : > { %299 = vperm.xlu1 %1636, %v1739_v7   ;;  %486 = vperm.xlu0 %1637, %v1739_v7  }
  0x24   : > { %309 = vperm.xlu1 %1636, %v1746_v8   ;;  %494 = vperm.xlu0 %1637, %v1746_v8  }
  0x28   : > { %319 = vperm.xlu1 %1636, %v1753_v9   ;;  %502 = vperm.xlu0 %1637, %v1753_v9  }
  0x2c   : > { %329 = vperm.xlu1 %1636, %v1760_v10   ;;  %510 = vperm.xlu0 %1637, %v1760_v10  }
  0x30   : > { %339 = vperm.xlu1 %1636, %v1767_v11   ;;  %518 = vperm.xlu0 %1637, %v1767_v11  }
  0x34   : > { %349 = vperm.xlu1 %1636, %v1774_v12   ;;  %526 = vperm.xlu0 %1637, %v1774_v12  }
  0x38   : > { %359 = vperm.xlu1 %1636, %v1781_v13   ;;  %534 = vperm.xlu0 %1637, %v1781_v13  }
  0x3c   : > { %369 = vperm.xlu1 %1636, %v1788_v14   ;;  %542 = vperm.xlu0 %1637, %v1788_v14  }
  0x40   : > { %379 = vperm.xlu1 %1636, %v1795_v15   ;;  %550 = vperm.xlu0 %1637, %v1795_v15  }
  0x44   : > { %389 = vperm.xlu1 %1636, %v1802_v16   ;;  %558 = vperm.xlu0 %1637, %v1802_v16  }
  0x48   : > { %399 = vperm.xlu1 %1636, %v1809_v17   ;;  %566 = vperm.xlu0 %1637, %v1809_v17  }
  0x4c   : > { %409 = vperm.xlu1 %1636, %v1816_v18   ;;  %574 = vperm.xlu0 %1637, %v1816_v18  }
  0x50   : > { %1638 = vset.pattern.permute.xlu1 %v1657_v2  ;;  %1640 = vset.pattern.permute.xlu0 %v1659_v20 }
  0x51   : > { %454 = vperm.xlu1 %1638, %v1823_v19   ;;  %651 = vperm.xlu0 %1640, %v1823_v19  }
  0x55   : > { %458 = vperm.xlu1 %1638, %v1705_v0   ;;  %663 = vperm.xlu0 %1640, %v1830_v21  }
  0x59   : > { %466 = vperm.xlu1 %1638, %v1830_v21   ;;  %671 = vperm.xlu0 %1640, %v1837_v22  }
  0x5d   : > { %474 = vperm.xlu1 %1638, %v1837_v22   ;;  %679 = vperm.xlu0 %1640, %v1844_v23  }
  0x61   : > { %482 = vperm.xlu1 %1638, %v1844_v23   ;;  %687 = vperm.xlu0 %1640, %v1851_v24  }
  0x65   : > { %490 = vperm.xlu1 %1638, %v1851_v24   ;;  %695 = vperm.xlu0 %1640, %v1858_v25  }
  0x69   : > { %498 = vperm.xlu1 %1638, %v1858_v25   ;;  %703 = vperm.xlu0 %1640, %v1865_v26  }
  0x6d   : > { %506 = vperm.xlu1 %1638, %v1865_v26   ;;  %711 = vperm.xlu0 %1640, %v1872_v27  }
  0x71   : > { %514 = vperm.xlu1 %1638, %v1872_v27   ;;  %719 = vperm.xlu0 %1640, %v1879_v28  }
  0x75   : > { %522 = vperm.xlu1 %1638, %v1879_v28   ;;  %727 = vperm.xlu0 %1640, %v1886_v29  }
  0x79   : > { %530 = vperm.xlu1 %1638, %v1886_v29   ;;  %735 = vperm.xlu0 %1640, %v1893_v30  }
  0x7d   : > { %538 = vperm.xlu1 %1638, %v1893_v30   ;;  %743 = vperm.xlu0 %1640, %v1900_v31  }
  0x81   : > { %546 = vperm.xlu1 %1638, %v1900_v31   ;;  %751 = vperm.xlu0 %1640, %v1907_v32  }
  0x85   : > { %554 = vperm.xlu1 %1638, %v1907_v32   ;;  %759 = vperm.xlu0 %1640, %v1914_v33  }
  0x89   : > { %562 = vperm.xlu1 %1638, %v1914_v33   ;;  %767 = vperm.xlu0 %1640, %v1921_v34  }
  0x8d   : > { %570 = vperm.xlu1 %1638, %v1921_v34   ;;  %1641 = vset.pattern.permute.xlu0 %v1660_v35 }
  0x8e   : > { %844 = vperm.xlu0 %1641, %v1710_v1  }
  0x8f   : > { %v1928_v36 = vpop.permute.xlu1 %264  ;;  %v1930_v37 = vpop.permute.xlu0 %450 }
  0x91   : > { %1639 = vset.pattern.permute.xlu1 %v1659_v20 }
  0x92   : > { %647 = vperm.xlu1 %1639, %v1710_v1   ;;  %856 = vperm.xlu0 %1641, %v1718_v4  }
  0x93   : > { %v1934_v38 = vpop.permute.xlu1 %269  ;;  %v1936_v39 = vpop.permute.xlu0 %462 }
  0x96   : > { %655 = vperm.xlu1 %1639, %v1705_v0   ;;  %864 = vperm.xlu0 %1641, %v1725_v5  }
  0x97   : > { %v1940_v40 = vpop.permute.xlu1 %279  ;;  %v1942_v41 = vpop.permute.xlu0 %470 }
  0x9a   : > { %659 = vperm.xlu1 %1639, %v1718_v4   ;;  %872 = vperm.xlu0 %1641, %v1732_v6  }
  0x9b   : > { %v1946_v42 = vpop.permute.xlu1 %289  ;;  %v1948_v43 = vpop.permute.xlu0 %478 }
  0x9e   : > { %667 = vperm.xlu1 %1639, %v1725_v5   ;;  %880 = vperm.xlu0 %1641, %v1739_v7  }
  0x9f   : > { %v1952_v44 = vpop.permute.xlu1 %299  ;;  %v1954_v45 = vpop.permute.xlu0 %486 }
  0xa0   : > { %2749 = vst [vmem:[#allocation3_spill] sm:$0xff] %v1954_v45 }
  0xa2   : > { %675 = vperm.xlu1 %1639, %v1732_v6   ;;  %888 = vperm.xlu0 %1641, %v1746_v8  }
  0xa3   : > { %v1958_v46 = vpop.permute.xlu1 %309  ;;  %v1960_v47 = vpop.permute.xlu0 %494 }
  0xa4   : > { %2750 = vst [vmem:[#allocation4_spill] sm:$0xff] %v1958_v46  ;;  %2751 = vst [vmem:[#allocation5_spill] sm:$0xff] %v1960_v47  ;;  %v1304_v47 = vld [vmem:[%s2745_s3 + $0x48] sm:$0xff]  ;;  %v2318_v46 = vld [vmem:[%s215_s7 + $0x3] ss:$0 sm:$0xff] }
  0xa6   : > { %683 = vperm.xlu1 %1639, %v1739_v7   ;;  %896 = vperm.xlu0 %1641, %v1753_v9  }
  0xa7   : > { %v1964_v48 = vpop.permute.xlu1 %319  ;;  %v1966_v49 = vpop.permute.xlu0 %502 }
  0xa8   : > { %2752 = vst [vmem:[#allocation6_spill] sm:$0xff] %v1964_v48  ;;  %2753 = vst [vmem:[#allocation7_spill] sm:$0xff] %v1966_v49  ;;  %v2305_v49 = vld [vmem:[%s215_s7 + $0x2] ss:$0 sm:$0xff] }
  0xaa   : > { %691 = vperm.xlu1 %1639, %v1746_v8   ;;  %904 = vperm.xlu0 %1641, %v1760_v10  }
  0xab   : > { %v1970_v50 = vpop.permute.xlu1 %329  ;;  %v1972_v51 = vpop.permute.xlu0 %510 }
  0xac   : > { %2754 = vst [vmem:[#allocation8_spill] sm:$0xff] %v1970_v50  ;;  %2755 = vst [vmem:[#allocation9_spill] sm:$0xff] %v1972_v51  ;;  %v1048_v51 = vld [vmem:[%s2744_s2 + $0x48] sm:$0xff]  ;;  %v1050_v50 = vld [vmem:[%s2744_s2 + $0x58] sm:$0xff] }
  0xae   : > { %699 = vperm.xlu1 %1639, %v1753_v9   ;;  %912 = vperm.xlu0 %1641, %v1767_v11  }
  0xaf   : > { %v1976_v52 = vpop.permute.xlu1 %339  ;;  %v1978_v53 = vpop.permute.xlu0 %518 }
  0xb0   : > { %2756 = vst [vmem:[#allocation10_spill] sm:$0xff] %v1976_v52  ;;  %2757 = vst [vmem:[#allocation11_spill] sm:$0xff] %v1978_v53  ;;  %v1053_v53 = vld [vmem:[%s2744_s2 + $0x70] sm:$0xff]  ;;  %v1046_v52 = vld [vmem:[%s2744_s2 + $0x38] sm:$0xff] }
  0xb2   : > { %707 = vperm.xlu1 %1639, %v1760_v10   ;;  %920 = vperm.xlu0 %1641, %v1774_v12  }
  0xb3   : > { %v1982_v54 = vpop.permute.xlu1 %349  ;;  %v1984_v55 = vpop.permute.xlu0 %526 }
  0xb4   : > { %2758 = vst [vmem:[#allocation12_spill] sm:$0xff] %v1982_v54  ;;  %2759 = vst [vmem:[#allocation13_spill] sm:$0xff] %v1984_v55  ;;  %v1051_v55 = vld [vmem:[%s2744_s2 + $0x60] sm:$0xff]  ;;  %v1044_v54 = vld [vmem:[%s2744_s2 + $0x28] sm:$0xff] }
  0xb6   : > { %715 = vperm.xlu1 %1639, %v1767_v11   ;;  %928 = vperm.xlu0 %1641, %v1781_v13  }
  0xb7   : > { %v1988_v56 = vpop.permute.xlu1 %359  ;;  %v1990_v57 = vpop.permute.xlu0 %534 }
  0xb8   : > { %2760 = vst [vmem:[#allocation14_spill] sm:$0xff] %v1988_v56  ;;  %2761 = vst [vmem:[#allocation15_spill] sm:$0xff] %v1990_v57  ;;  %v1041_v57 = vld [vmem:[%s2744_s2 + $0x10] sm:$0xff]  ;;  %v1042_v56 = vld [vmem:[%s2744_s2 + $0x18] sm:$0xff] }
  0xba   : > { %723 = vperm.xlu1 %1639, %v1774_v12   ;;  %936 = vperm.xlu0 %1641, %v1788_v14  }
  0xbb   : > { %v1994_v58 = vpop.permute.xlu1 %369  ;;  %v1996_v59 = vpop.permute.xlu0 %542 }
  0xbc   : > { %2762 = vst [vmem:[#allocation16_spill] sm:$0xff] %v1994_v58  ;;  %2763 = vst [vmem:[#allocation17_spill] sm:$0xff] %v1996_v59 }
  0xbe   : > { %731 = vperm.xlu1 %1639, %v1781_v13   ;;  %944 = vperm.xlu0 %1641, %v1795_v15  }
  0xbf   : > { %v2000_v60 = vpop.permute.xlu1 %379  ;;  %v2002_v61 = vpop.permute.xlu0 %550 }
  0xc0   : > { %2764 = vst [vmem:[#allocation18_spill] sm:$0xff] %v2000_v60  ;;  %2765 = vst [vmem:[#allocation19_spill] sm:$0xff] %v2002_v61  ;;  %v1045_v61 = vld [vmem:[%s2744_s2 + $0x30] sm:$0xff] }
  0xc2   : > { %739 = vperm.xlu1 %1639, %v1788_v14   ;;  %952 = vperm.xlu0 %1641, %v1802_v16  }
  0xc3   : > { %v2006_v62 = vpop.permute.xlu1 %389  ;;  %v2008_v63 = vpop.permute.xlu0 %558 }
  0xc4   : > { %2766 = vst [vmem:[#allocation20_spill] sm:$0xff] %v2006_v62  ;;  %2767 = vst [vmem:[#allocation21_spill] sm:$0xff] %v2008_v63 }
  0xc6   : > { %747 = vperm.xlu1 %1639, %v1795_v15   ;;  %960 = vperm.xlu0 %1641, %v1809_v17  }
  0xc7   : > { %v2012_v2 = vpop.permute.xlu1 %399  ;;  %v2014_v4 = vpop.permute.xlu0 %566 }
  0xc8   : > { %2768 = vst [vmem:[#allocation22_spill] sm:$0xff] %v2012_v2  ;;  %2769 = vst [vmem:[#allocation23_spill] sm:$0xff] %v2014_v4 }
  0xca   : > { %755 = vperm.xlu1 %1639, %v1802_v16   ;;  %968 = vperm.xlu0 %1641, %v1816_v18  }
  0xcb   : > { %v2018_v5 = vpop.permute.xlu1 %409  ;;  %v2020_v6 = vpop.permute.xlu0 %574 }
  0xcc   : > { %2770 = vst [vmem:[#allocation24_spill] sm:$0xff] %v2018_v5  ;;  %2771 = vst [vmem:[#allocation25_spill] sm:$0xff] %v2020_v6 }
  0xce   : > { %763 = vperm.xlu1 %1639, %v1809_v17   ;;  %1643 = vset.pattern.permute.xlu0 %v2748_v3 }
  0xcf   : > { %254 = vperm.xlu0 %1643, %v1710_v1  }
  0xd0   : > { %v2025_v7 = vpop.permute.xlu1 %454  ;;  %v2027_v8 = vpop.permute.xlu0 %651 }
  0xd2   : > { %771 = vperm.xlu1 %1639, %v1816_v18  }
  0xd3   : > { %259 = vperm.xlu0 %1643, %v1823_v19  }
  0xd4   : > { %v2031_v9 = vpop.permute.xlu1 %458  ;;  %v2033_v10 = vpop.permute.xlu0 %663 }
  0xd6   : > { %1642 = vset.pattern.permute.xlu1 %v1660_v35 }
  0xd7   : > { %848 = vperm.xlu1 %1642, %v1823_v19   ;;  %274 = vperm.xlu0 %1643, %v1830_v21  }
  0xd8   : > { %v2038_v11 = vpop.permute.xlu1 %466  ;;  %v2040_v1 = vpop.permute.xlu0 %671 }
  0xdb   : > { %852 = vperm.xlu1 %1642, %v1705_v0   ;;  %284 = vperm.xlu0 %1643, %v1837_v22  }
  0xdc   : > { %v2044_v12 = vpop.permute.xlu1 %474  ;;  %v2046_v13 = vpop.permute.xlu0 %679 }
  0xdf   : > { %860 = vperm.xlu1 %1642, %v1830_v21   ;;  %294 = vperm.xlu0 %1643, %v1844_v23  }
  0xe0   : > { %v2050_v14 = vpop.permute.xlu1 %482  ;;  %v2052_v15 = vpop.permute.xlu0 %687 }
  0xe3   : > { %868 = vperm.xlu1 %1642, %v1837_v22   ;;  %304 = vperm.xlu0 %1643, %v1851_v24  }
  0xe4   : > { %v2056_v16 = vpop.permute.xlu1 %490  ;;  %v2058_v0 = vpop.permute.xlu0 %695 }
  0xe7   : > { %876 = vperm.xlu1 %1642, %v1844_v23   ;;  %314 = vperm.xlu0 %1643, %v1858_v25  }
  0xe8   : > { %v2062_v17 = vpop.permute.xlu1 %498  ;;  %v2064_v18 = vpop.permute.xlu0 %703 }
  0xeb   : > { %884 = vperm.xlu1 %1642, %v1851_v24   ;;  %324 = vperm.xlu0 %1643, %v1865_v26  }
  0xec   : > { %v2068_v19 = vpop.permute.xlu1 %506  ;;  %v2070_v20 = vpop.permute.xlu0 %711 }
  0xef   : > { %892 = vperm.xlu1 %1642, %v1858_v25   ;;  %334 = vperm.xlu0 %1643, %v1872_v27  }
  0xf0   : > { %v2074_v21 = vpop.permute.xlu1 %514  ;;  %v2076_v22 = vpop.permute.xlu0 %719 }
  0xf3   : > { %900 = vperm.xlu1 %1642, %v1865_v26   ;;  %344 = vperm.xlu0 %1643, %v1879_v28  }
  0xf4   : > { %v2080_v23 = vpop.permute.xlu1 %522  ;;  %v2082_v24 = vpop.permute.xlu0 %727 }
  0xf7   : > { %908 = vperm.xlu1 %1642, %v1872_v27   ;;  %354 = vperm.xlu0 %1643, %v1886_v29  }
  0xf8   : > { %v2086_v35 = vpop.permute.xlu1 %530  ;;  %v2088_v25 = vpop.permute.xlu0 %735 }
  0xfb   : > { %916 = vperm.xlu1 %1642, %v1879_v28   ;;  %364 = vperm.xlu0 %1643, %v1893_v30  }
  0xfc   : > { %v2092_v3 = vpop.permute.xlu1 %538  ;;  %v2094_v26 = vpop.permute.xlu0 %743 }
  0xff   : > { %924 = vperm.xlu1 %1642, %v1886_v29   ;;  %374 = vperm.xlu0 %1643, %v1900_v31  }
 0x100   : > { %v2098_v6 = vpop.permute.xlu1 %546  ;;  %v2100_v27 = vpop.permute.xlu0 %751 }
 0x103   : > { %932 = vperm.xlu1 %1642, %v1893_v30   ;;  %384 = vperm.xlu0 %1643, %v1907_v32   ;;  %v1040_v30 = vld [vmem:[%s2744_s2 + $0x8] sm:$0xff] }
 0x104   : > { %v2104_v5 = vpop.permute.xlu1 %554  ;;  %v2106_v28 = vpop.permute.xlu0 %759 }
 0x107   : > { %940 = vperm.xlu1 %1642, %v1900_v31   ;;  %394 = vperm.xlu0 %1643, %v1914_v33   ;;  %v1043_v31 = vld [vmem:[%s2744_s2 + $0x20] sm:$0xff] }
 0x108   : > { %v2110_v4 = vpop.permute.xlu1 %562  ;;  %v2112_v29 = vpop.permute.xlu0 %767 }
 0x10b   : > { %948 = vperm.xlu1 %1642, %v1907_v32   ;;  %404 = vperm.xlu0 %1643, %v1921_v34  }
 0x10c   : > { %v2116_v2 = vpop.permute.xlu1 %570 }
 0x10d   : > { %v2121_v63 = vpop.permute.xlu0 %844 }
 0x10f   : > { %956 = vperm.xlu1 %1642, %v1914_v33   ;;  %1078 = vperm.xlu0 %1643, %v1040_v30   ;;  %v1039_v33 = vld [vmem:[%s2744_s2] sm:$0xff]  ;;  %v2773_v30 = vmov 0  }
 0x111   : > { %v2127_v62 = vpop.permute.xlu1 %647  ;;  %v2129_v32 = vpop.permute.xlu0 %856 }
 0x113   : > { %964 = vperm.xlu1 %1642, %v1921_v34   ;;  %1093 = vperm.xlu0 %1643, %v1043_v31   ;;  %v1047_v34 = vld [vmem:[%s2744_s2 + $0x40] sm:$0xff] }
 0x115   : > { %v2135_v60 = vpop.permute.xlu1 %655  ;;  %v2137_v59 = vpop.permute.xlu0 %864 }
 0x116   : > { %2772 = vst [vmem:[#allocation26_spill] sm:$0xff] %v2137_v59 }
 0x117   : > { %1644 = vset.pattern.permute.xlu1 %v2773_v30  ;;  %1103 = vperm.xlu0 %1643, %v1045_v61   ;;  %v1049_v30 = vld [vmem:[%s2744_s2 + $0x50] sm:$0xff] }
 0x118   : > { %1073 = vperm.xlu1 %1644, %v1039_v33  }
 0x119   : > { %v2146_v31 = vpop.permute.xlu1 %659  ;;  %v2148_v58 = vpop.permute.xlu0 %872 }
 0x11a   : > { %2774 = vst [vmem:[#allocation27_spill] sm:$0xff] %v2148_v58 }
 0x11b   : > { %1113 = vperm.xlu0 %1643, %v1047_v34  }
 0x11c   : > { %1083 = vperm.xlu1 %1644, %v1041_v57  }
 0x11d   : > { %v2156_v61 = vpop.permute.xlu1 %667  ;;  %v2158_v33 = vpop.permute.xlu0 %880 }
 0x11e   : > { %2775 = vst [vmem:[#allocation28_spill] sm:$0xff] %v2158_v33  ;;  %v2303_v33 = vld [vmem:[%s215_s7 + $0x1] ss:$0 sm:$0xff] }
 0x11f   : > { %1123 = vperm.xlu0 %1643, %v1049_v30  }
 0x120   : > { %1088 = vperm.xlu1 %1644, %v1042_v56  }
 0x121   : > { %v2166_v34 = vpop.permute.xlu1 %675  ;;  %v2168_v57 = vpop.permute.xlu0 %888 }
 0x122   : > { %2776 = vst [vmem:[#allocation29_spill] sm:$0xff] %v2168_v57  ;;  %v1055_v57 = vld [vmem:[%s2744_s2 + $0x80] sm:$0xff] }
 0x123   : > { %1133 = vperm.xlu0 %1643, %v1051_v55  }
 0x124   : > { %1098 = vperm.xlu1 %1644, %v1044_v54  }
 0x125   : > { %v2176_v30 = vpop.permute.xlu1 %683  ;;  %v2178_v56 = vpop.permute.xlu0 %896 }
 0x126   : > { %2777 = vst [vmem:[#allocation30_spill] sm:$0xff] %v2176_v30  ;;  %2778 = vst [vmem:[#allocation31_spill] sm:$0xff] %v2178_v56  ;;  %v1057_v56 = vld [vmem:[%s2744_s2 + $0x90] sm:$0xff] }
 0x127   : > { %1143 = vperm.xlu0 %1643, %v1053_v53  }
 0x128   : > { %1108 = vperm.xlu1 %1644, %v1046_v52  }
 0x129   : > { %v2186_v55 = vpop.permute.xlu1 %691  ;;  %v2188_v54 = vpop.permute.xlu0 %904 }
 0x12a   : > { %2779 = vst [vmem:[#allocation32_spill] sm:$0xff] %v2186_v55  ;;  %2780 = vst [vmem:[#allocation33_spill] sm:$0xff] %v2188_v54  ;;  %v1059_v54 = vld [vmem:[%s2744_s2 + $0xa0] sm:$0xff]  ;;  %v779_v55 = vmul.f32 %v2305_v49, %v2027_v8  ;;  %v1313_v8 = vld [vmem:[%s2745_s3 + $0x90] sm:$0xff] }
 0x12b   : > { %1153 = vperm.xlu0 %1643, %v1055_v57  }
 0x12c   : > { %1118 = vperm.xlu1 %1644, %v1048_v51  }
 0x12d   : > { %v2196_v53 = vpop.permute.xlu1 %699  ;;  %v2198_v52 = vpop.permute.xlu0 %912 }
 0x12e   : > { %2781 = vst [vmem:[#allocation34_spill] sm:$0xff] %v2196_v53  ;;  %2782 = vst [vmem:[#allocation35_spill] sm:$0xff] %v2198_v52  ;;  %v1052_v53 = vld [vmem:[%s2744_s2 + $0x68] sm:$0xff]  ;;  %v1295_v52 = vld [vmem:[%s2745_s3] sm:$0xff] }
 0x12f   : > { %1163 = vperm.xlu0 %1643, %v1057_v56  }
 0x130   : > { %1128 = vperm.xlu1 %1644, %v1050_v50  }
 0x131   : > { %v2206_v57 = vpop.permute.xlu1 %707  ;;  %v2208_v51 = vpop.permute.xlu0 %920 }
 0x132   : > { %2783 = vst [vmem:[#allocation36_spill] sm:$0xff] %v2206_v57  ;;  %2784 = vst [vmem:[#allocation37_spill] sm:$0xff] %v2208_v51  ;;  %v1054_v57 = vld [vmem:[%s2744_s2 + $0x78] sm:$0xff]  ;;  %v1297_v51 = vld [vmem:[%s2745_s3 + $0x10] sm:$0xff] }
 0x133   : > { %1173 = vperm.xlu0 %1643, %v1059_v54  }
 0x134   : > { %1138 = vperm.xlu1 %1644, %v1052_v53  }
 0x135   : > { %v2216_v56 = vpop.permute.xlu1 %715  ;;  %v2218_v50 = vpop.permute.xlu0 %928 }
 0x136   : > { %2785 = vst [vmem:[#allocation38_spill] sm:$0xff] %v2216_v56  ;;  %2786 = vst [vmem:[#allocation39_spill] sm:$0xff] %v2218_v50  ;;  %v1056_v56 = vld [vmem:[%s2744_s2 + $0x88] sm:$0xff] }
 0x137   : > { %1329 = vperm.xlu0 %1643, %v1295_v52   ;;  %v1299_v52 = vld [vmem:[%s2745_s3 + $0x20] sm:$0xff] }
 0x138   : > { %1148 = vperm.xlu1 %1644, %v1054_v57  }
 0x139   : > { %v2226_v54 = vpop.permute.xlu1 %723  ;;  %v2228_v53 = vpop.permute.xlu0 %936 }
 0x13a   : > { %2787 = vst [vmem:[#allocation40_spill] sm:$0xff] %v2226_v54  ;;  %2788 = vst [vmem:[#allocation41_spill] sm:$0xff] %v2228_v53  ;;  %v1058_v54 = vld [vmem:[%s2744_s2 + $0x98] sm:$0xff] }
 0x13b   : > { %1339 = vperm.xlu0 %1643, %v1297_v51   ;;  %v1301_v51 = vld [vmem:[%s2745_s3 + $0x30] sm:$0xff] }
 0x13c   : > { %1158 = vperm.xlu1 %1644, %v1056_v56  }
 0x13d   : > { %v2236_v57 = vpop.permute.xlu1 %731  ;;  %v2238_v50 = vpop.permute.xlu0 %944 }
 0x13e   : > { %2789 = vst [vmem:[#allocation42_spill] sm:$0xff] %v2236_v57  ;;  %2790 = vst [vmem:[#allocation43_spill] sm:$0xff] %v2238_v50  ;;  %v1060_v57 = vld [vmem:[%s2744_s2 + $0xa8] sm:$0xff] }
 0x13f   : > { %1349 = vperm.xlu0 %1643, %v1299_v52  }
 0x140   : > { %1168 = vperm.xlu1 %1644, %v1058_v54   ;;  %v1303_v54 = vld [vmem:[%s2745_s3 + $0x40] sm:$0xff] }
 0x141   : > { %v2246_v56 = vpop.permute.xlu1 %739  ;;  %v2248_v53 = vpop.permute.xlu0 %952 }
 0x142   : > { %2791 = vst [vmem:[#allocation44_spill] sm:$0xff] %v2246_v56  ;;  %2792 = vst [vmem:[#allocation45_spill] sm:$0xff] %v2248_v53  ;;  %v1296_v53 = vld [vmem:[%s2745_s3 + $0x8] sm:$0xff] }
 0x143   : > { %1359 = vperm.xlu0 %1643, %v1301_v51  }
 0x144   : > { %1178 = vperm.xlu1 %1644, %v1060_v57   ;;  %v1305_v57 = vld [vmem:[%s2745_s3 + $0x50] sm:$0xff] }
 0x145   : > { %v2258_v52 = vpop.permute.xlu1 %747  ;;  %v2260_v50 = vpop.permute.xlu0 %960 }
 0x146   : > { %2793 = vst [vmem:[#allocation46_spill] sm:$0xff] %v2258_v52  ;;  %2794 = vst [vmem:[#allocation47_spill] sm:$0xff] %v2260_v50  ;;  %v1298_v50 = vld [vmem:[%s2745_s3 + $0x18] sm:$0xff]  ;;  %v1300_v52 = vld [vmem:[%s2745_s3 + $0x28] sm:$0xff] }
 0x147   : > { %1369 = vperm.xlu0 %1643, %v1303_v54   ;;  %v1307_v54 = vld [vmem:[%s2745_s3 + $0x60] sm:$0xff] }
 0x148   : > { %1334 = vperm.xlu1 %1644, %v1296_v53  }
 0x149   : > { %v2272_v51 = vpop.permute.xlu1 %755  ;;  %v2274_v56 = vpop.permute.xlu0 %968 }
 0x14a   : > { %2795 = vst [vmem:[#allocation48_spill] sm:$0xff] %v2272_v51  ;;  %2796 = vst [vmem:[#allocation49_spill] sm:$0xff] %v2274_v56  ;;  %v1302_v56 = vld [vmem:[%s2745_s3 + $0x38] sm:$0xff] }
 0x14b   : > { %1379 = vperm.xlu0 %1643, %v1305_v57  }
 0x14c   : > { %1344 = vperm.xlu1 %1644, %v1298_v50   ;;  %v1309_v50 = vld [vmem:[%s2745_s3 + $0x70] sm:$0xff] }
 0x14d   : > { %v2283_v53 = vpop.permute.xlu1 %763 }
 0x14e   : > { %2797 = vst [vmem:[#allocation50_spill] sm:$0xff] %v2283_v53  ;;  %v2288_v51 = vpop.permute.xlu0 %254  ;;  %v2301_v53 = vld [vmem:[%s215_s7] ss:$0 sm:$0xff] }
 0x14f   : > { %1389 = vperm.xlu0 %1643, %v1307_v54  }
 0x150   : > { %1354 = vperm.xlu1 %1644, %v1300_v52   ;;  %v582_v52 = vmul.f32 %v2303_v33, %v2025_v7 }
 0x151   : > { %v2296_v57 = vpop.permute.xlu1 %771 }
 0x152   : > { %2798 = vst [vmem:[#allocation51_spill] sm:$0xff] %v2296_v57  ;;  %v260_v48 = vpop.permute.xlu0 %259  ;;  %v1311_v57 = vld [vmem:[%s2745_s3 + $0x80] sm:$0xff] }
 0x153   : > { %v417_v54 = vmul.f32 %v2301_v53, %v260_v48  ;;  %1399 = vperm.xlu0 %1643, %v1309_v50  }
 0x154   : > { %1364 = vperm.xlu1 %1644, %v1302_v56  }
 0x155   : > { %v614_v58 = vadd.f32 %v582_v52, %v417_v54  ;;  %v585_v52 = vmul.f32 %v2303_v33, %v2038_v11  ;;  %v1306_v54 = vld [vmem:[%s2745_s3 + $0x58] sm:$0xff]  ;;  %v782_v11 = vmul.f32 %v2305_v49, %v2033_v10 }
 0x156   : > { %v849_v30 = vpop.permute.xlu1 %848  ;;  %v275_v7 = vpop.permute.xlu0 %274  ;;  %v1062_v10 = vld [vmem:[%s2744_s2 + $0xb8] sm:$0xff] }
 0x157   : > { %v976_v48 = vmul.f32 %v2318_v46, %v849_v30  ;;  %v420_v56 = vmul.f32 %v2301_v53, %v275_v7  ;;  %1409 = vperm.xlu0 %1643, %v1311_v57   ;;  %v811_v50 = vadd.f32 %v779_v55, %v614_v58  ;;  %v587_v55 = vmul.f32 %v2303_v33, %v2044_v12  ;;  %v1308_v57 = vld [vmem:[%s2745_s3 + $0x68] sm:$0xff] }
 0x158   : > { %1374 = vperm.xlu1 %1644, %v1304_v47   ;;  %v1061_v47 = vld [vmem:[%s2744_s2 + $0xb0] sm:$0xff]  ;;  %v784_v12 = vmul.f32 %v2305_v49, %v2040_v1  ;;  %v1063_v1 = vld [vmem:[%s2744_s2 + $0xc0] sm:$0xff] }
 0x159   : > { %v2330_v59 = vadd.f32 %v976_v48, %v811_v50  ;;  %v617_v7 = vadd.f32 %v585_v52, %v420_v56 }
 0x15a   : > { %v2332_v45 = vpop.permute.xlu1 %852  ;;  %v285_v30 = vpop.permute.xlu0 %284 }
 0x15b   : > { %v422_v58 = vmul.f32 %v2301_v53, %v285_v30  ;;  %1419 = vperm.xlu0 %1643, %v1313_v8   ;;  %v589_v30 = vmul.f32 %v2303_v33, %v2050_v14  ;;  %v786_v14 = vmul.f32 %v2305_v49, %v2046_v13  ;;  %v1064_v13 = vld [vmem:[%s2744_s2 + $0xc8] sm:$0xff] }
 0x15c   : > { %1384 = vperm.xlu1 %1644, %v1306_v54   ;;  %v814_v54 = vadd.f32 %v782_v11, %v617_v7 }
 0x15d   : > { %v619_v50 = vadd.f32 %v587_v55, %v422_v58  ;;  %v1310_v58 = vld [vmem:[%s2745_s3 + $0x78] sm:$0xff] }
 0x15e   : > { %v861_v48 = vpop.permute.xlu1 %860  ;;  %v295_v56 = vpop.permute.xlu0 %294 }
 0x15f   : > { %v979_v8 = vmul.f32 %v2318_v46, %v861_v48  ;;  %v424_v52 = vmul.f32 %v2301_v53, %v295_v56  ;;  %1183 = vperm.xlu0 %1643, %v1061_v47   ;;  %v816_v56 = vadd.f32 %v784_v12, %v619_v50 }
 0x160   : > { %1394 = vperm.xlu1 %1644, %v1308_v57  }
 0x161   : > { %v2357_v55 = vadd.f32 %v979_v8, %v814_v54  ;;  %v621_v7 = vadd.f32 %v589_v30, %v424_v52  ;;  %v591_v8 = vmul.f32 %v2303_v33, %v2056_v16  ;;  %v1312_v52 = vld [vmem:[%s2745_s3 + $0x88] sm:$0xff]  ;;  %v788_v16 = vmul.f32 %v2305_v49, %v2052_v15  ;;  %v1065_v15 = vld [vmem:[%s2744_s2 + $0xd0] sm:$0xff] }
 0x162   : > { %v869_v48 = vpop.permute.xlu1 %868  ;;  %v305_v47 = vpop.permute.xlu0 %304 }
 0x163   : > { %v981_v11 = vmul.f32 %v2318_v46, %v869_v48  ;;  %v426_v57 = vmul.f32 %v2301_v53, %v305_v47  ;;  %1188 = vperm.xlu0 %1643, %v1062_v10   ;;  %v818_v48 = vadd.f32 %v786_v14, %v621_v7  ;;  %v593_v47 = vmul.f32 %v2303_v33, %v2062_v17 }
 0x164   : > { %1404 = vperm.xlu1 %1644, %v1310_v58   ;;  %v790_v17 = vmul.f32 %v2305_v49, %v2058_v0  ;;  %v1066_v0 = vld [vmem:[%s2744_s2 + $0xd8] sm:$0xff] }
 0x165   : > { %v2371_v54 = vadd.f32 %v981_v11, %v816_v56  ;;  %v623_v50 = vadd.f32 %v591_v8, %v426_v57  ;;  %v1314_v11 = vld [vmem:[%s2745_s3 + $0x98] sm:$0xff] }
 0x166   : > { %v877_v30 = vpop.permute.xlu1 %876  ;;  %v315_v10 = vpop.permute.xlu0 %314 }
 0x167   : > { %v983_v12 = vmul.f32 %v2318_v46, %v877_v30  ;;  %v428_v58 = vmul.f32 %v2301_v53, %v315_v10  ;;  %1193 = vperm.xlu0 %1643, %v1063_v1   ;;  %v595_v30 = vmul.f32 %v2303_v33, %v2068_v19  ;;  %v1315_v10 = vld [vmem:[%s2745_s3 + $0xa0] sm:$0xff]  ;;  %v792_v19 = vmul.f32 %v2305_v49, %v2064_v18 }
 0x168   : > { %1414 = vperm.xlu1 %1644, %v1312_v52   ;;  %v820_v52 = vadd.f32 %v788_v16, %v623_v50  ;;  %v1067_v18 = vld [vmem:[%s2744_s2 + $0xe0] sm:$0xff] }
 0x169   : > { %v2385_v57 = vadd.f32 %v983_v12, %v818_v48  ;;  %v625_v7 = vadd.f32 %v593_v47, %v428_v58 }
 0x16a   : > { %v885_v56 = vpop.permute.xlu1 %884  ;;  %v325_v1 = vpop.permute.xlu0 %324 }
 0x16b   : > { %v985_v14 = vmul.f32 %v2318_v46, %v885_v56  ;;  %v430_v8 = vmul.f32 %v2301_v53, %v325_v1  ;;  %1198 = vperm.xlu0 %1643, %v1064_v13   ;;  %v822_v47 = vadd.f32 %v790_v17, %v625_v7  ;;  %v1316_v56 = vld [vmem:[%s2745_s3 + $0xa8] sm:$0xff] }
 0x16c   : > { %1424 = vperm.xlu1 %1644, %v1314_v11   ;;  %v597_v11 = vmul.f32 %v2303_v33, %v2074_v21  ;;  %v794_v21 = vmul.f32 %v2305_v49, %v2070_v20  ;;  %v1068_v20 = vld [vmem:[%s2744_s2 + $0xe8] sm:$0xff] }
 0x16d   : > { %v2399_v12 = vadd.f32 %v985_v14, %v820_v52  ;;  %v627_v50 = vadd.f32 %v595_v30, %v430_v8  ;;  %v599_v30 = vmul.f32 %v2303_v33, %v2080_v23  ;;  %v796_v23 = vmul.f32 %v2305_v49, %v2076_v22  ;;  %v1069_v22 = vld [vmem:[%s2744_s2 + $0xf0] sm:$0xff] }
 0x16e   : > { %v893_v58 = vpop.permute.xlu1 %892  ;;  %v335_v48 = vpop.permute.xlu0 %334 }
 0x16f   : > { %v987_v13 = vmul.f32 %v2318_v46, %v893_v58  ;;  %v432_v16 = vmul.f32 %v2301_v53, %v335_v48  ;;  %1203 = vperm.xlu0 %1643, %v1065_v15   ;;  %v824_v17 = vadd.f32 %v792_v19, %v627_v50  ;;  %v601_v19 = vmul.f32 %v2303_v33, %v2086_v35 }
 0x170   : > { %1429 = vperm.xlu1 %1644, %v1315_v10   ;;  %v1317_v10 = vld [vmem:[%s2745_s3 + $0xb0] sm:$0xff]  ;;  %v798_v35 = vmul.f32 %v2305_v49, %v2082_v24  ;;  %v800_v24 = vmul.f32 %v2305_v49, %v2088_v25  ;;  %v802_v25 = vmul.f32 %v2305_v49, %v2094_v26  ;;  %v804_v26 = vmul.f32 %v2305_v49, %v2100_v27 }
 0x171   : > { %v2413_v1 = vadd.f32 %v987_v13, %v822_v47  ;;  %v629_v7 = vadd.f32 %v597_v11, %v432_v16  ;;  %v1318_v11 = vld [vmem:[%s2745_s3 + $0xb8] sm:$0xff] }
 0x172   : > { %v901_v14 = vpop.permute.xlu1 %900  ;;  %v345_v8 = vpop.permute.xlu0 %344 }
 0x173   : > { %v989_v52 = vmul.f32 %v2318_v46, %v901_v14  ;;  %v434_v15 = vmul.f32 %v2301_v53, %v345_v8  ;;  %1208 = vperm.xlu0 %1643, %v1066_v0   ;;  %v826_v0 = vadd.f32 %v794_v21, %v629_v7  ;;  %v1319_v21 = vld [vmem:[%s2745_s3 + $0xc0] sm:$0xff] }
 0x174   : > { %1434 = vperm.xlu1 %1644, %v1316_v56  }
 0x175   : > { %v2427_v58 = vadd.f32 %v989_v52, %v824_v17  ;;  %v631_v50 = vadd.f32 %v599_v30, %v434_v15 }
 0x176   : > { %v909_v48 = vpop.permute.xlu1 %908  ;;  %v355_v13 = vpop.permute.xlu0 %354 }
 0x177   : > { %v991_v16 = vmul.f32 %v2318_v46, %v909_v48  ;;  %v436_v47 = vmul.f32 %v2301_v53, %v355_v13  ;;  %1213 = vperm.xlu0 %1643, %v1067_v18   ;;  %v828_v17 = vadd.f32 %v796_v23, %v631_v50  ;;  %v603_v18 = vmul.f32 %v2303_v33, %v2092_v3  ;;  %v1070_v3 = vld [vmem:[%s2744_s2 + $0xf8] sm:$0xff] }
 0x178   : > { %1439 = vperm.xlu1 %1644, %v1317_v10  }
 0x179   : > { %v2441_v56 = vadd.f32 %v991_v16, %v826_v0  ;;  %v633_v7 = vadd.f32 %v601_v19, %v436_v47  ;;  %v605_v0 = vmul.f32 %v2303_v33, %v2098_v6  ;;  %v1325_v6 = vld [vmem:[%s2745_s3 + $0xf0] sm:$0xff] }
 0x17a   : > { %v917_v14 = vpop.permute.xlu1 %916  ;;  %v365_v8 = vpop.permute.xlu0 %364 }
 0x17b   : > { %v993_v52 = vmul.f32 %v2318_v46, %v917_v14  ;;  %v438_v15 = vmul.f32 %v2301_v53, %v365_v8  ;;  %1218 = vperm.xlu0 %1643, %v1068_v20   ;;  %v830_v47 = vadd.f32 %v798_v35, %v633_v7  ;;  %v1320_v20 = vld [vmem:[%s2745_s3 + $0xc8] sm:$0xff] }
 0x17c   : > { %1444 = vperm.xlu1 %1644, %v1318_v11  }
 0x17d   : > { %v2455_v30 = vadd.f32 %v993_v52, %v828_v17  ;;  %v635_v13 = vadd.f32 %v603_v18, %v438_v15  ;;  %v607_v15 = vmul.f32 %v2303_v33, %v2104_v5  ;;  %v1321_v17 = vld [vmem:[%s2745_s3 + $0xd0] sm:$0xff]  ;;  %v609_v5 = vmul.f32 %v2303_v33, %v2110_v4 }
 0x17e   : > { %v925_v10 = vpop.permute.xlu1 %924  ;;  %v375_v48 = vpop.permute.xlu0 %374  ;;  %v581_v4 = vmul.f32 %v2303_v33, %v1930_v37 }
 0x17f   : > { %v995_v50 = vmul.f32 %v2318_v46, %v925_v10  ;;  %v440_v16 = vmul.f32 %v2301_v53, %v375_v48  ;;  %1223 = vperm.xlu0 %1643, %v1069_v22   ;;  %v832_v52 = vadd.f32 %v800_v24, %v635_v13 }
 0x180   : > { %1449 = vperm.xlu1 %1644, %v1319_v21  }
 0x181   : > { %v2469_v23 = vadd.f32 %v995_v50, %v830_v47  ;;  %v637_v14 = vadd.f32 %v605_v0, %v440_v16  ;;  %v1322_v50 = vld [vmem:[%s2745_s3 + $0xd8] sm:$0xff]  ;;  %v416_v47 = vmul.f32 %v2301_v53, %v2288_v51  ;;  %v1323_v51 = vld [vmem:[%s2745_s3 + $0xe0] sm:$0xff] }
 0x182   : > { %v933_v19 = vpop.permute.xlu1 %932  ;;  %v385_v11 = vpop.permute.xlu0 %384 }
 0x183   : > { %v997_v8 = vmul.f32 %v2318_v46, %v933_v19  ;;  %v442_v7 = vmul.f32 %v2301_v53, %v385_v11  ;;  %1228 = vperm.xlu0 %1643, %v1070_v3   ;;  %v834_v13 = vadd.f32 %v802_v25, %v637_v14  ;;  %v806_v11 = vmul.f32 %v2305_v49, %v2106_v28  ;;  %v1324_v28 = vld [vmem:[%s2745_s3 + $0xe8] sm:$0xff] }
 0x184   : > { %1454 = vperm.xlu1 %1644, %v1320_v20   ;;  %v611_v14 = vmul.f32 %v2303_v33, %v2116_v2  ;;  %v808_v2 = vmul.f32 %v2305_v49, %v2112_v29  ;;  %v1326_v29 = vld [vmem:[%s2745_s3 + $0xf8] sm:$0xff] }
 0x185   : > { %v2483_v22 = vadd.f32 %v997_v8, %v832_v52  ;;  %v639_v21 = vadd.f32 %v607_v15, %v442_v7  ;;  %v613_v7 = vadd.f32 %v581_v4, %v416_v47 }
 0x186   : > { %v941_v35 = vpop.permute.xlu1 %940  ;;  %v395_v18 = vpop.permute.xlu0 %394 }
 0x187   : > { %v999_v10 = vmul.f32 %v2318_v46, %v941_v35  ;;  %v444_v48 = vmul.f32 %v2301_v53, %v395_v18  ;;  %1479 = vperm.xlu0 %1643, %v1325_v6   ;;  %v836_v27 = vadd.f32 %v804_v26, %v639_v21 }
 0x188   : > { %1459 = vperm.xlu1 %1644, %v1321_v17   ;;  %v778_v17 = vmul.f32 %v2305_v49, %v2127_v62  ;;  %v975_v62 = vmul.f32 %v2318_v46, %v2121_v63 }
 0x189   : > { %v2494_v16 = vadd.f32 %v999_v10, %v834_v13  ;;  %v641_v0 = vadd.f32 %v609_v5, %v444_v48 }
 0x18a   : > { %v949_v3 = vpop.permute.xlu1 %948  ;;  %v405_v24 = vpop.permute.xlu0 %404  ;;  %v810_v10 = vadd.f32 %v778_v17, %v613_v7 }
 0x18b   : > { %2799 = vst [vmem:[#allocation52_spill] sm:$0xff] %v2494_v16  ;;  %v1001_v20 = vmul.f32 %v2318_v46, %v949_v3  ;;  %v446_v19 = vmul.f32 %v2301_v53, %v405_v24  ;;  %v838_v37 = vadd.f32 %v806_v11, %v641_v0 }
 0x18c   : > { %1464 = vperm.xlu1 %1644, %v1322_v50   ;;  %v1007_v50 = vadd.f32 %v975_v62, %v810_v10  ;;  %v780_v62 = vmul.f32 %v2305_v49, %v2135_v60  ;;  %v978_v60 = vmul.f32 %v2318_v46, %v2129_v32 }
 0x18d   : > { %v2509_v8 = vadd.f32 %v1001_v20, %v836_v27  ;;  %v643_v25 = vadd.f32 %v611_v14, %v446_v19 }
 0x18e   : > { %v957_v52 = vpop.permute.xlu1 %956  ;;  %v1079_v6 = vpop.permute.xlu0 %1078 }
 0x18f   : > { %2800 = vst [vmem:[#allocation53_spill] sm:$0xff] %v2509_v8  ;;  %v1003_v15 = vmul.f32 %v2318_v46, %v957_v52  ;;  %v840_v13 = vadd.f32 %v808_v2, %v643_v25  ;;  %v419_v2 = vmul.f32 %v2301_v53, %v1934_v38  ;;  %v421_v38 = vmul.f32 %v2301_v53, %v1940_v40 }
 0x190   : > { %1469 = vperm.xlu1 %1644, %v1323_v51  }
 0x191   : > { %v2519_v35 = vadd.f32 %v1003_v15, %v838_v37 }
 0x192   : > { %v965_v18 = vpop.permute.xlu1 %964  ;;  %v2521_v21 = vpop.permute.xlu0 %1093 }
 0x193   : > { %2801 = vst [vmem:[#allocation54_spill] sm:$0xff] %v2519_v35  ;;  %v1005_v48 = vmul.f32 %v2318_v46, %v965_v18  ;;  %v583_v18 = vmul.f32 %v2303_v33, %v2031_v9 }
 0x194   : > { %1474 = vperm.xlu1 %1644, %v1324_v28   ;;  %v584_v28 = vmul.f32 %v2303_v33, %v1936_v39  ;;  %v586_v39 = vmul.f32 %v2303_v33, %v1942_v41  ;;  %v423_v41 = vmul.f32 %v2301_v53, %v1946_v42  ;;  %v2803_v42 = vld [vmem:[#allocation3_spill] sm:$0xff] }
 0x195   : > { %v2529_v26 = vadd.f32 %v1005_v48, %v840_v13  ;;  %v418_v13 = vmul.f32 %v2301_v53, %v1928_v36  ;;  %v783_v36 = vmul.f32 %v2305_v49, %v2156_v61  ;;  %v785_v61 = vmul.f32 %v2305_v49, %v2166_v34 }
 0x196   : > { %v2531_v5 = vpop.permute.xlu0 %1103  ;;  %v618_v40 = vadd.f32 %v586_v39, %v421_v38  ;;  %v425_v38 = vmul.f32 %v2301_v53, %v1952_v44  ;;  %v590_v39 = vmul.f32 %v2303_v33, %v2803_v42  ;;  %v1235_v44 = vadd.f32 %v2521_v21, %v2357_v55  ;;  %v2809_v21 = vld [vmem:[#allocation32_spill] sm:$0xff] }
 0x197   : > { %2802 = vst [vmem:[#allocation55_spill] sm:$0xff] %v2529_v26  ;;  %v1074_v47 = vpop.permute.xlu1 %1073  ;;  %v615_v9 = vadd.f32 %v583_v18, %v418_v13 }
 0x198   : > { %v2533_v3 = vadd.f32 %v1074_v47, %v1007_v50  ;;  %1484 = vperm.xlu1 %1644, %v1326_v29   ;;  %v781_v29 = vmul.f32 %v2305_v49, %v2146_v31  ;;  %v616_v50 = vadd.f32 %v584_v28, %v419_v2  ;;  %v977_v47 = vmul.f32 %v2318_v46, %v2332_v45 }
 0x199   : > { %v812_v31 = vadd.f32 %v780_v62, %v615_v9  ;;  %v588_v2 = vmul.f32 %v2303_v33, %v1948_v43  ;;  %v1232_v45 = vadd.f32 %v1079_v6, %v2330_v59  ;;  %v815_v13 = vadd.f32 %v783_v36, %v618_v40  ;;  %v2804_v43 = vld [vmem:[#allocation26_spill] sm:$0xff] }
 0x19a   : > { %v2535_v24 = vpop.permute.xlu0 %1113  ;;  %v813_v8 = vadd.f32 %v781_v29, %v616_v50  ;;  %v980_v59 = vmul.f32 %v2318_v46, %v2804_v43  ;;  %v1263_v50 = vmax.f32 %v2533_v3, 0.0  ;;  %v2805_v36 = vld [vmem:[#allocation30_spill] sm:$0xff]  ;;  %v2807_v3 = vld [vmem:[#allocation5_spill] sm:$0xff] }
 0x19b   : > { %v1084_v0 = vpop.permute.xlu1 %1083  ;;  %v1009_v28 = vadd.f32 %v977_v47, %v812_v31  ;;  %v620_v29 = vadd.f32 %v588_v2, %v423_v41  ;;  %v1264_v6 = vmax.f32 %v1232_v45, 0.0  ;;  %v622_v2 = vadd.f32 %v590_v39, %v425_v38 }
 0x19c   : > { %v1010_v62 = vadd.f32 %v978_v60, %v813_v8  ;;  %v787_v8 = vmul.f32 %v2305_v49, %v2805_v36  ;;  %v1267_v39 = vmax.f32 %v1235_v44, 0.0 }
 0x19d   : > { %v1233_v32 = vadd.f32 %v1084_v0, %v1009_v28  ;;  %v817_v34 = vadd.f32 %v785_v61, %v620_v29  ;;  %v1012_v0 = vadd.f32 %v980_v59, %v815_v13  ;;  %v2806_v28 = vld [vmem:[#allocation4_spill] sm:$0xff] }
 0x19e   : > { %v2537_v20 = vpop.permute.xlu0 %1123  ;;  %v427_v45 = vmul.f32 %v2301_v53, %v2806_v28  ;;  %v819_v55 = vadd.f32 %v787_v8, %v622_v2  ;;  %v2810_v28 = vld [vmem:[#allocation6_spill] sm:$0xff] }
 0x19f   : > { %v1089_v63 = vpop.permute.xlu1 %1088  ;;  %v1265_v31 = vmax.f32 %v1233_v32, 0.0 }
 0x1a0   : > { %v1234_v9 = vadd.f32 %v1089_v63, %v1010_v62  ;;  %v592_v63 = vmul.f32 %v2303_v33, %v2807_v3  ;;  %v2808_v62 = vld [vmem:[#allocation27_spill] sm:$0xff] }
 0x1a1   : > { %v982_v61 = vmul.f32 %v2318_v46, %v2808_v62  ;;  %v1239_v62 = vadd.f32 %v2535_v24, %v2385_v57  ;;  %v2817_v57 = vld [vmem:[#allocation36_spill] sm:$0xff] }
 0x1a2   : > { %v2539_v19 = vpop.permute.xlu0 %1133  ;;  %v1266_v29 = vmax.f32 %v1234_v9, 0.0  ;;  %v793_v24 = vmul.f32 %v2305_v49, %v2817_v57 }
 0x1a3   : > { %v1099_v27 = vpop.permute.xlu1 %1098  ;;  %v1014_v32 = vadd.f32 %v982_v61, %v817_v34 }
 0x1a4   : > { %v1236_v42 = vadd.f32 %v1099_v27, %v1012_v0  ;;  %v429_v27 = vmul.f32 %v2301_v53, %v2810_v28  ;;  %v2812_v0 = vld [vmem:[#allocation28_spill] sm:$0xff]  ;;  %v1271_v28 = vmax.f32 %v1239_v62, 0.0 }
 0x1a5   : > { %v984_v8 = vmul.f32 %v2318_v46, %v2812_v0 }
 0x1a6   : > { %v2541_v4 = vpop.permute.xlu0 %1143 }
 0x1a7   : > { %v2543_v11 = vpop.permute.xlu1 %1108 }
 0x1a8   : > { %v1238_v34 = vadd.f32 %v2543_v11, %v1014_v32 }
 0x1aa   : > { %v2545_v14 = vpop.permute.xlu0 %1153  ;;  %v1270_v32 = vmax.f32 %v1238_v34, 0.0  ;;  %v2820_v34 = vld [vmem:[#allocation31_spill] sm:$0xff] }
 0x1ab   : > { %v2547_v51 = vpop.permute.xlu1 %1118 }
 0x1ae   : > { %v2549_v7 = vpop.permute.xlu0 %1163 }
 0x1af   : > { %v2551_v52 = vpop.permute.xlu1 %1128 }
 0x1b2   : > { %v2553_v25 = vpop.permute.xlu0 %1173 }
 0x1b3   : > { %v2555_v15 = vpop.permute.xlu1 %1138 }
 0x1b6   : > { %v1330_v37 = vpop.permute.xlu0 %1329 }
 0x1b7   : > { %v2557_v17 = vpop.permute.xlu1 %1148  ;;  %v1487_v40 = vmul.f32 %v1330_v37, %v1263_v50  ;;  %v789_v37 = vmul.f32 %v2305_v49, %v2809_v21  ;;  %v2816_v21 = vld [vmem:[#allocation29_spill] sm:$0xff] }
 0x1ba   : > { %v1340_v10 = vpop.permute.xlu0 %1339 }
 0x1bb   : > { %v2565_v48 = vpop.permute.xlu1 %1158  ;;  %v1489_v13 = vmul.f32 %v1340_v10, %v1265_v31  ;;  %v2811_v10 = vld [vmem:[#allocation7_spill] sm:$0xff]  ;;  %v1268_v31 = vmax.f32 %v1236_v42, 0.0  ;;  %v2814_v42 = vld [vmem:[#allocation8_spill] sm:$0xff] }
 0x1bc   : > { %v594_v9 = vmul.f32 %v2303_v33, %v2811_v10  ;;  %v431_v11 = vmul.f32 %v2301_v53, %v2814_v42 }
 0x1be   : > { %v1350_v26 = vpop.permute.xlu0 %1349 }
 0x1bf   : > { %v2581_v35 = vpop.permute.xlu1 %1168 }
 0x1c2   : > { %v1360_v18 = vpop.permute.xlu0 %1359 }
 0x1c3   : > { %v2592_v16 = vpop.permute.xlu1 %1178 }
 0x1c6   : > { %v2601_v47 = vpop.permute.xlu0 %1369 }
 0x1c7   : > { %v1335_v60 = vpop.permute.xlu1 %1334 }
 0x1c8   : > { %v1488_v41 = vmul.f32 %v1335_v60, %v1264_v6  ;;  %v1237_v6 = vadd.f32 %v2531_v5, %v2371_v54  ;;  %v624_v60 = vadd.f32 %v592_v63, %v427_v45  ;;  %v2813_v5 = vld [vmem:[#allocation34_spill] sm:$0xff]  ;;  %v1016_v45 = vadd.f32 %v984_v8, %v819_v55 }
 0x1c9   : > { %v791_v2 = vmul.f32 %v2305_v49, %v2813_v5  ;;  %v2818_v8 = vld [vmem:[#allocation10_spill] sm:$0xff]  ;;  %v1495_v5 = vmul.f32 %v2601_v47, %v1271_v28  ;;  %v1245_v28 = vadd.f32 %v2541_v4, %v2427_v58  ;;  %v1247_v58 = vadd.f32 %v2545_v14, %v2441_v56 }
 0x1ca   : > { %v1519_v43 = vadd.f32 %v1488_v41, %v1487_v40  ;;  %v2613_v59 = vpop.permute.xlu0 %1379  ;;  %v1491_v40 = vmul.f32 %v1350_v26, %v1267_v39  ;;  %v821_v54 = vadd.f32 %v789_v37, %v624_v60  ;;  %v1269_v63 = vmax.f32 %v1237_v6, 0.0  ;;  %v2815_v26 = vld [vmem:[#allocation9_spill] sm:$0xff] }
 0x1cb   : > { %v1345_v38 = vpop.permute.xlu1 %1344  ;;  %v986_v37 = vmul.f32 %v2318_v46, %v2816_v21  ;;  %v1240_v55 = vadd.f32 %v2547_v51, %v1016_v45  ;;  %v2819_v51 = vld [vmem:[#allocation11_spill] sm:$0xff]  ;;  %v2824_v21 = vld [vmem:[#allocation33_spill] sm:$0xff] }
 0x1cc   : > { %v1490_v50 = vmul.f32 %v1345_v38, %v1266_v29  ;;  %v1520_v36 = vadd.f32 %v1519_v43, %v1489_v13  ;;  %v626_v13 = vadd.f32 %v594_v9, %v429_v27  ;;  %v596_v43 = vmul.f32 %v2303_v33, %v2815_v26  ;;  %v2822_v26 = vld [vmem:[#allocation12_spill] sm:$0xff] }
 0x1cd   : > { %v1493_v38 = vmul.f32 %v1360_v18, %v1269_v63  ;;  %v1241_v27 = vadd.f32 %v2537_v20, %v2399_v12  ;;  %v598_v18 = vmul.f32 %v2303_v33, %v2819_v51  ;;  %v2821_v20 = vld [vmem:[#allocation38_spill] sm:$0xff] }
 0x1ce   : > { %v1521_v44 = vadd.f32 %v1520_v36, %v1490_v50  ;;  %v2626_v41 = vpop.permute.xlu0 %1389  ;;  %v823_v50 = vadd.f32 %v791_v2, %v626_v13  ;;  %v1018_v36 = vadd.f32 %v986_v37, %v821_v54  ;;  %v628_v0 = vadd.f32 %v596_v43, %v431_v11  ;;  %v2823_v43 = vld [vmem:[#allocation13_spill] sm:$0xff] }
 0x1cf   : > { %v1355_v3 = vpop.permute.xlu1 %1354  ;;  %v600_v47 = vmul.f32 %v2303_v33, %v2823_v43  ;;  %v990_v37 = vmul.f32 %v2318_v46, %v2824_v21 }
 0x1d0   : > { %v1492_v61 = vmul.f32 %v1355_v3, %v1268_v31  ;;  %v1522_v29 = vadd.f32 %v1521_v44, %v1491_v40  ;;  %v433_v31 = vmul.f32 %v2301_v53, %v2818_v8  ;;  %v988_v40 = vmul.f32 %v2318_v46, %v2820_v34 }
 0x1d1   : > { %v1272_v44 = vmax.f32 %v1240_v55, 0.0  ;;  %v1242_v54 = vadd.f32 %v2551_v52, %v1018_v36  ;;  %v825_v12 = vadd.f32 %v793_v24, %v628_v0  ;;  %v795_v3 = vmul.f32 %v2305_v49, %v2821_v20  ;;  %v2826_v0 = vld [vmem:[#allocation35_spill] sm:$0xff] }
 0x1d2   : > { %v1523_v39 = vadd.f32 %v1522_v29, %v1492_v61  ;;  %v1400_v6 = vpop.permute.xlu0 %1399  ;;  %v1020_v63 = vadd.f32 %v988_v40, %v823_v50  ;;  %v1273_v61 = vmax.f32 %v1241_v27, 0.0  ;;  %v1243_v29 = vadd.f32 %v2539_v19, %v2413_v1  ;;  %v2825_v19 = vld [vmem:[#allocation40_spill] sm:$0xff]  ;;  %v2828_v20 = vld [vmem:[#allocation15_spill] sm:$0xff] }
 0x1d3   : > { %v1365_v60 = vpop.permute.xlu1 %1364  ;;  %v630_v11 = vadd.f32 %v598_v18, %v433_v31  ;;  %v435_v52 = vmul.f32 %v2301_v53, %v2822_v26  ;;  %v797_v57 = vmul.f32 %v2305_v49, %v2825_v19  ;;  %v1022_v24 = vadd.f32 %v990_v37, %v825_v12 }
 0x1d4   : > { %v1494_v10 = vmul.f32 %v1365_v60, %v1270_v32  ;;  %v1524_v9 = vadd.f32 %v1523_v39, %v1493_v38  ;;  %v1274_v32 = vmax.f32 %v1242_v54, 0.0  ;;  %v1244_v55 = vadd.f32 %v2555_v15, %v1020_v63 }
 0x1d5   : > { %v1497_v38 = vmul.f32 %v2613_v59, %v1273_v61  ;;  %v827_v1 = vadd.f32 %v795_v3, %v630_v11  ;;  %v1275_v60 = vmax.f32 %v1243_v29, 0.0  ;;  %v992_v15 = vmul.f32 %v2318_v46, %v2826_v0 }
 0x1d6   : > { %v1525_v2 = vadd.f32 %v1524_v9, %v1494_v10  ;;  %v1410_v45 = vpop.permute.xlu0 %1409  ;;  %v632_v9 = vadd.f32 %v600_v47, %v435_v52  ;;  %v1276_v8 = vmax.f32 %v1244_v55, 0.0  ;;  %v1246_v59 = vadd.f32 %v2557_v17, %v1022_v24  ;;  %v2829_v17 = vld [vmem:[#allocation37_spill] sm:$0xff]  ;;  %v2831_v24 = vld [vmem:[#allocation16_spill] sm:$0xff] }
 0x1d7   : > { %v1375_v62 = vpop.permute.xlu1 %1374  ;;  %v1499_v31 = vmul.f32 %v2626_v41, %v1275_v60  ;;  %v1024_v40 = vadd.f32 %v992_v15, %v827_v1  ;;  %v1277_v54 = vmax.f32 %v1245_v28, 0.0  ;;  %v602_v3 = vmul.f32 %v2303_v33, %v2828_v20  ;;  %v2832_v60 = vld [vmem:[#allocation17_spill] sm:$0xff]  ;;  %v2834_v15 = vld [vmem:[#allocation44_spill] sm:$0xff] }
 0x1d8   : > { %v1496_v13 = vmul.f32 %v1375_v62, %v1272_v44  ;;  %v1526_v42 = vadd.f32 %v1525_v2, %v1495_v5  ;;  %v829_v34 = vadd.f32 %v797_v57, %v632_v9  ;;  %v2827_v2 = vld [vmem:[#allocation14_spill] sm:$0xff]  ;;  %v994_v41 = vmul.f32 %v2318_v46, %v2829_v17  ;;  %v2837_v20 = vld [vmem:[#allocation41_spill] sm:$0xff] }
 0x1d9   : > { %v437_v12 = vmul.f32 %v2301_v53, %v2827_v2  ;;  %v1278_v63 = vmax.f32 %v1246_v59, 0.0  ;;  %v1248_v62 = vadd.f32 %v2565_v48, %v1024_v40  ;;  %v1501_v61 = vmul.f32 %v1400_v6, %v1277_v54  ;;  %v2836_v2 = vld [vmem:[#allocation19_spill] sm:$0xff] }
 0x1da   : > { %v1527_v39 = vadd.f32 %v1526_v42, %v1496_v13  ;;  %v1420_v50 = vpop.permute.xlu0 %1419  ;;  %v2830_v42 = vld [vmem:[#allocation42_spill] sm:$0xff]  ;;  %v1026_v14 = vadd.f32 %v994_v41, %v829_v34  ;;  %v1279_v26 = vmax.f32 %v1247_v58, 0.0  ;;  %v1249_v52 = vadd.f32 %v2549_v7, %v2455_v30  ;;  %v2833_v7 = vld [vmem:[#allocation39_spill] sm:$0xff] }
 0x1db   : > { %v1385_v36 = vpop.permute.xlu1 %1384  ;;  %v799_v56 = vmul.f32 %v2305_v49, %v2830_v42  ;;  %v634_v21 = vadd.f32 %v602_v3, %v437_v12  ;;  %v1280_v37 = vmax.f32 %v1248_v62, 0.0  ;;  %v604_v30 = vmul.f32 %v2303_v33, %v2832_v60 }
 0x1dc   : > { %v1498_v27 = vmul.f32 %v1385_v36, %v1274_v32  ;;  %v1528_v10 = vadd.f32 %v1527_v39, %v1497_v38  ;;  %v1250_v32 = vadd.f32 %v2581_v35, %v1026_v14  ;;  %v1503_v55 = vmul.f32 %v1410_v45, %v1279_v26 }
 0x1dd   : > { %v831_v39 = vadd.f32 %v799_v56, %v634_v21  ;;  %v1281_v1 = vmax.f32 %v1249_v52, 0.0  ;;  %v439_v36 = vmul.f32 %v2301_v53, %v2831_v24  ;;  %v996_v28 = vmul.f32 %v2318_v46, %v2833_v7 }
 0x1de   : > { %v1529_v51 = vadd.f32 %v1528_v10, %v1498_v27  ;;  %v1184_v18 = vpop.permute.xlu0 %1183  ;;  %v1251_v35 = vadd.f32 %v2553_v25, %v2469_v23  ;;  %v1282_v45 = vmax.f32 %v1250_v32, 0.0  ;;  %v2835_v25 = vld [vmem:[#allocation18_spill] sm:$0xff]  ;;  %v606_v12 = vmul.f32 %v2303_v33, %v2836_v2  ;;  %v2849_v2 = vld [vmem:[#allocation24_spill] sm:$0xff] }
 0x1df   : > { %v1395_v44 = vpop.permute.xlu1 %1394  ;;  %v1505_v27 = vmul.f32 %v1420_v50, %v1281_v1  ;;  %v1028_v59 = vadd.f32 %v996_v28, %v831_v39  ;;  %v636_v34 = vadd.f32 %v604_v30, %v439_v36  ;;  %v441_v50 = vmul.f32 %v2301_v53, %v2835_v25  ;;  %v2842_v39 = vld [vmem:[#allocation52_spill] sm:$0xff] }
 0x1e0   : > { %v1500_v4 = vmul.f32 %v1395_v44, %v1276_v8  ;;  %v1530_v5 = vadd.f32 %v1529_v51, %v1499_v31  ;;  %v801_v8 = vmul.f32 %v2305_v49, %v2834_v15  ;;  %v1283_v40 = vmax.f32 %v1251_v35, 0.0  ;;  %v2844_v15 = vld [vmem:[#allocation22_spill] sm:$0xff] }
 0x1e1   : > { %v1252_v44 = vadd.f32 %v2592_v16, %v1028_v59  ;;  %v998_v3 = vmul.f32 %v2318_v46, %v2837_v20  ;;  %v1253_v41 = vadd.f32 %v1184_v18, %v2483_v22  ;;  %v2838_v16 = vld [vmem:[#allocation46_spill] sm:$0xff]  ;;  %v638_v14 = vadd.f32 %v606_v12, %v441_v50  ;;  %v2841_v18 = vld [vmem:[#allocation43_spill] sm:$0xff]  ;;  %v2850_v20 = vld [vmem:[#allocation25_spill] sm:$0xff] }
 0x1e2   : > { %v1531_v29 = vadd.f32 %v1530_v5, %v1500_v4  ;;  %v1189_v13 = vpop.permute.xlu0 %1188  ;;  %v833_v4 = vadd.f32 %v801_v8, %v636_v34  ;;  %v445_v8 = vmul.f32 %v2301_v53, %v2844_v15  ;;  %v2845_v59 = vld [vmem:[#allocation23_spill] sm:$0xff]  ;;  %v447_v12 = vmul.f32 %v2301_v53, %v2849_v2 }
 0x1e3   : > { %v1405_v11 = vpop.permute.xlu1 %1404  ;;  %v1284_v17 = vmax.f32 %v1252_v44, 0.0  ;;  %v2847_v44 = vld [vmem:[#allocation53_spill] sm:$0xff] }
 0x1e4   : > { %v1502_v43 = vmul.f32 %v1405_v11, %v1278_v63  ;;  %v1532_v47 = vadd.f32 %v1531_v29, %v1501_v61  ;;  %v803_v61 = vmul.f32 %v2305_v49, %v2838_v16  ;;  %v1030_v29 = vadd.f32 %v998_v3, %v833_v4 }
 0x1e5   : > { %v1285_v11 = vmax.f32 %v1253_v41, 0.0  ;;  %v612_v3 = vmul.f32 %v2303_v33, %v2850_v20 }
 0x1e6   : > { %v1533_v48 = vadd.f32 %v1532_v47, %v1502_v43  ;;  %v1194_v6 = vpop.permute.xlu0 %1193  ;;  %v1254_v26 = vadd.f32 %v1189_v13, %v1030_v29  ;;  %v835_v43 = vadd.f32 %v803_v61, %v638_v14  ;;  %v2843_v13 = vld [vmem:[#allocation48_spill] sm:$0xff] }
 0x1e7   : > { %v1415_v38 = vpop.permute.xlu1 %1414  ;;  %v1255_v1 = vadd.f32 %v1194_v6, %v2842_v39  ;;  %v805_v36 = vmul.f32 %v2305_v49, %v2843_v13  ;;  %v610_v6 = vmul.f32 %v2303_v33, %v2845_v59  ;;  %v2855_v39 = vld [vmem:[#allocation55_spill] sm:$0xff] }
 0x1e8   : > { %v1504_v19 = vmul.f32 %v1415_v38, %v1280_v37  ;;  %v1534_v57 = vadd.f32 %v1533_v48, %v1503_v55  ;;  %v2839_v37 = vld [vmem:[#allocation20_spill] sm:$0xff]  ;;  %v2840_v55 = vld [vmem:[#allocation21_spill] sm:$0xff]  ;;  %v1000_v48 = vmul.f32 %v2318_v46, %v2841_v18  ;;  %v1286_v38 = vmax.f32 %v1254_v26, 0.0  ;;  %v2852_v26 = vld [vmem:[#allocation47_spill] sm:$0xff] }
 0x1e9   : > { %v443_v32 = vmul.f32 %v2301_v53, %v2839_v37  ;;  %v608_v22 = vmul.f32 %v2303_v33, %v2840_v55  ;;  %v1287_v28 = vmax.f32 %v1255_v1, 0.0  ;;  %v2853_v53 = vld [vmem:[#allocation54_spill] sm:$0xff] }
 0x1ea   : > { %v1535_v10 = vadd.f32 %v1534_v57, %v1504_v19  ;;  %v1199_v9 = vpop.permute.xlu0 %1198  ;;  %v1032_v60 = vadd.f32 %v1000_v48, %v835_v43 }
 0x1eb   : > { %v1425_v0 = vpop.permute.xlu1 %1424  ;;  %v640_v7 = vadd.f32 %v608_v22, %v443_v32  ;;  %v2854_v22 = vld [vmem:[#allocation49_spill] sm:$0xff] }
 0x1ec   : > { %v1506_v31 = vmul.f32 %v1425_v0, %v1282_v45  ;;  %v1536_v51 = vadd.f32 %v1535_v10, %v1505_v27  ;;  %v1256_v35 = vadd.f32 %v1199_v9, %v1032_v60  ;;  %v2848_v9 = vld [vmem:[#allocation50_spill] sm:$0xff]  ;;  %v1006_v18 = vmul.f32 %v2318_v46, %v2854_v22 }
 0x1ed   : > { %v837_v27 = vadd.f32 %v805_v36, %v640_v7 }
 0x1ee   : > { %v1204_v54 = vpop.permute.xlu0 %1203  ;;  %v1537_v5 = vadd.f32 %v1536_v51, %v1506_v31  ;;  %v2846_v51 = vld [vmem:[#allocation45_spill] sm:$0xff] }
 0x1ef   : > { %v1430_v58 = vpop.permute.xlu1 %1429  ;;  %v1002_v34 = vmul.f32 %v2318_v46, %v2846_v51 }
 0x1f0   : > { %v1507_v23 = vmul.f32 %v1430_v58, %v1283_v40  ;;  %v1288_v40 = vmax.f32 %v1256_v35, 0.0  ;;  %v1257_v58 = vadd.f32 %v1204_v54, %v2847_v44  ;;  %v2851_v54 = vld [vmem:[#allocation51_spill] sm:$0xff] }
 0x1f1   : > { %v1034_v25 = vadd.f32 %v1002_v34, %v837_v27  ;;  %v809_v29 = vmul.f32 %v2305_v49, %v2851_v54 }
 0x1f2   : > { %v1538_v63 = vadd.f32 %v1537_v5, %v1507_v23  ;;  %v1209_v56 = vpop.permute.xlu0 %1208  ;;  %v807_v23 = vmul.f32 %v2305_v49, %v2848_v9  ;;  %v1289_v41 = vmax.f32 %v1257_v58, 0.0 }
 0x1f3   : > { %v1435_v62 = vpop.permute.xlu1 %1434 }
 0x1f4   : > { %v1508_v42 = vmul.f32 %v1435_v62, %v1284_v17  ;;  %v642_v17 = vadd.f32 %v610_v6, %v445_v8 }
 0x1f6   : > { %v1539_v47 = vadd.f32 %v1538_v63, %v1508_v42  ;;  %v1214_v57 = vpop.permute.xlu0 %1213  ;;  %v1258_v63 = vadd.f32 %v1209_v56, %v1034_v25  ;;  %v839_v61 = vadd.f32 %v807_v23, %v642_v17 }
 0x1f7   : > { %v1440_v52 = vpop.permute.xlu1 %1439 }
 0x1f8   : > { %v1509_v21 = vmul.f32 %v1440_v52, %v1285_v11  ;;  %v644_v11 = vadd.f32 %v612_v3, %v447_v12  ;;  %v1004_v52 = vmul.f32 %v2318_v46, %v2852_v26  ;;  %v1290_v43 = vmax.f32 %v1258_v63, 0.0 }
 0x1fa   : > { %v1540_v19 = vadd.f32 %v1539_v47, %v1509_v21  ;;  %v1219_v31 = vpop.permute.xlu0 %1218  ;;  %v1259_v47 = vadd.f32 %v1214_v57, %v2853_v53  ;;  %v841_v37 = vadd.f32 %v809_v29, %v644_v11  ;;  %v1036_v32 = vadd.f32 %v1004_v52, %v839_v61 }
 0x1fb   : > { %v1445_v24 = vpop.permute.xlu1 %1444 }
 0x1fc   : > { %v1510_v30 = vmul.f32 %v1445_v24, %v1286_v38  ;;  %v1291_v48 = vmax.f32 %v1259_v47, 0.0  ;;  %v1260_v49 = vadd.f32 %v1219_v31, %v1036_v32 }
 0x1fe   : > { %v1541_v10 = vadd.f32 %v1540_v19, %v1510_v30  ;;  %v1224_v62 = vpop.permute.xlu0 %1223  ;;  %v1038_v19 = vadd.f32 %v1006_v18, %v841_v37  ;;  %v1292_v36 = vmax.f32 %v1260_v49, 0.0 }
 0x1ff   : > { %v1450_v45 = vpop.permute.xlu1 %1449  ;;  %v1261_v1 = vadd.f32 %v1224_v62, %v2855_v39 }
 0x200   : > { %v1511_v0 = vmul.f32 %v1450_v45, %v1287_v28 }
 0x201   : > { %v1293_v28 = vmax.f32 %v1261_v1, 0.0 }
 0x202   : > { %v1542_v4 = vadd.f32 %v1541_v10, %v1511_v0  ;;  %v1229_v55 = vpop.permute.xlu0 %1228 }
 0x203   : > { %v1455_v5 = vpop.permute.xlu1 %1454  ;;  %v1262_v60 = vadd.f32 %v1229_v55, %v1038_v19 }
 0x204   : > { %v1512_v50 = vmul.f32 %v1455_v5, %v1288_v40  ;;  %v1557_v40 = vstv %s1556_s25 }
 0x205   : > { %v1294_v45 = vmax.f32 %v1262_v60, 0.0 }
 0x206   : > { %v1543_v42 = vadd.f32 %v1542_v4, %v1512_v50  ;;  %v1480_v30 = vpop.permute.xlu0 %1479 }
 0x207   : > { %v1460_v16 = vpop.permute.xlu1 %1459  ;;  %v1517_v27 = vmul.f32 %v1480_v30, %v1293_v28 }
 0x208   : > { %v1513_v14 = vmul.f32 %v1460_v16, %v1289_v41 }
 0x20a   : > { %v1544_v21 = vadd.f32 %v1543_v42, %v1513_v14 }
 0x20b   : > { %v1465_v33 = vpop.permute.xlu1 %1464 }
 0x20c   : > { %v1514_v56 = vmul.f32 %v1465_v33, %v1290_v43 }
 0x20e   : > { %v1545_v24 = vadd.f32 %v1544_v21, %v1514_v56 }
 0x20f   : > { %v1470_v38 = vpop.permute.xlu1 %1469 }
 0x210   : > { %v1515_v13 = vmul.f32 %v1470_v38, %v1291_v48 }
 0x212   : > { %v1546_v57 = vadd.f32 %v1545_v24, %v1515_v13 }
 0x213   : > { %v1475_v7 = vpop.permute.xlu1 %1474 }
 0x214   : > { %v1516_v35 = vmul.f32 %v1475_v7, %v1292_v36 }
 0x216   : > { %v1547_v10 = vadd.f32 %v1546_v57, %v1516_v35 }
 0x217   : > { %v1485_v0 = vpop.permute.xlu1 %1484 }
 0x218   : > { %v1518_v46 = vmul.f32 %v1485_v0, %v1294_v45  ;;  %v1548_v15 = vadd.f32 %v1547_v10, %v1517_v27 }
 0x21a   : > { %v1549_v8 = vadd.f32 %v1548_v15, %v1518_v46 }
 0x21c   : > { %v1550_v59 = vrot.slane %v1549_v8, 4 }
 0x21e   : > { %v1551_v6 = vadd.f32 %v1550_v59, %v1549_v8 }
 0x220   : > { %v1552_v31 = vrot.slane %v1551_v6, 2 }
 0x222   : > { %v1553_v51 = vadd.f32 %v1552_v31, %v1551_v6 }
 0x224   : > { %v1554_v34 = vrot.slane %v1553_v51, 1 }
 0x226   : > { %v1555_v44 = vadd.f32 %v1554_v34, %v1553_v51 }
 0x228   : > { %v1558_v58 = vadd.f32 %v1557_v40, %v1555_v44 }
 0x22a   : > { %v1559_v4 = vsub.f32 0.0, %v1558_v58 }
 0x22c   : > { %v1560_v5 = vmul.f32 1.442695, %v1559_v4 }
 0x22e   : > { %1645 = vpow2.f32 %v1560_v5 }
 0x238   : > { %v1646_v9 = vpop.eup %1645 }
 0x239   : > { %v1562_v23 = vadd.f32 1.0, %v1646_v9 }
 0x23b   : > { %1647 = vrcp.f32 %v1562_v23 }
 0x245   : > { %v1648_v25 = vpop.eup %1647 }
 0x246   : > { %1564 = vst [vmem:[%s218_s28] sm:$0x1] %v1648_v25 }
 0x247 PF: > { %s16_s20 = sadd.s32 1, %s1655_s20  }
 0x248   : > { %p13_p4 = scmp.ge.s32.totalorder %s16_s20, 4  }
 0x24a   :  { %15 = sbr.rel (!%p13_p4) target bundleno = 2 (0x2), region = 70 }

</bundles_post_ra>
